<compile_context>
chip_gen: v6e
topology: v6e:2x2x1
jax: 0.10.0
libtpu: 0.0.40
codegen_flags: <defaults>
</compile_context>

<pallas_src>
import functools

import jax
import jax.numpy as jnp
from jax import lax
from jax.experimental import pallas as pl
from jax.experimental.pallas import tpu as pltpu


def _pick_time_block(seq_len: int, preferred: int) -> int:
    for cand in (preferred, 16, 8, 4, 2, 1):
        if cand <= seq_len and seq_len % cand == 0:
            return cand
    # TODO(synk): pad seq to a multiple of the time block instead of degrading.
    return 1


def _vmem_limit_bytes(resident_bytes: int) -> int:
    # Scoped-VMEM limit sized from resident buffers + headroom, clamped to
    # ~0.9x physical VMEM so it is legal on every generation (v7x = 64 MiB).
    cap = 64 * 1024 * 1024  # conservative default = v7x physical VMEM
    try:
        cap = int(pltpu.get_tpu_info().vmem_capacity_bytes)
    except Exception:
        pass
    cap = int(cap * 0.9)
    want = max(int(1.5 * resident_bytes), 32 * 1024 * 1024)
    return int(min(want, cap))


def _const_spec(block_shape, index_map):
    # Constant-index blocks: identical every grid step, so double-buffering
    # them wastes VMEM for zero pipelining benefit.  Request single buffering;
    # fall back gracefully if this JAX build lacks per-spec pipeline_mode.
    if hasattr(pl, "Buffered"):
        try:
            return pl.BlockSpec(block_shape, index_map,
                                pipeline_mode=pl.Buffered(1))
        except TypeError:
            pass
    return pl.BlockSpec(block_shape, index_map)


# ----------------------------------------------------------------------------
# Phase 1: hoisted input projection (time-independent, fully parallel).
# ----------------------------------------------------------------------------
def _input_proj_kernel(x0_ref, x1_ref, w0_ref, w1_ref, gx_ref):
    t_blk, bsz, d = x0_ref.shape
    n4h = gx_ref.shape[-1]
    cd = w0_ref.dtype

    # (T_BLK, B, D) -> (T_BLK*B, D): big-M matmul that actually fills the MXU.
    # Layout-free only because B % 8 == 0 (asserted in the wrapper).
    x0 = x0_ref[...].reshape(t_blk * bsz, d).astype(cd)
    x1 = x1_ref[...].reshape(t_blk * bsz, d).astype(cd)

    # Concat folded into two partial dots against the pre-transposed W_ih halves.
    acc = jnp.dot(x0, w0_ref[...], preferred_element_type=jnp.float32)
    acc = acc + jnp.dot(x1, w1_ref[...], preferred_element_type=jnp.float32)

    # No bias here: the (f32) bias is added in Phase 2 so that the bf16 gx
    # store does not round the bias contribution.
    gx_ref[...] = acc.reshape(t_blk, bsz, n4h).astype(gx_ref.dtype)


# ----------------------------------------------------------------------------
# Phase 2: serial LSTM recurrence (only h @ W_hh^T per step) + residual add.
# Grid = (batch_blocks [parallel], time_blocks [arbitrary]).
# ----------------------------------------------------------------------------
def _lstm_recurrence_kernel(gx_ref, res_ref, whh_ref, b_ref, o_ref,
                            h_sc, c_sc):
    t_blk, b_blk, n4h = gx_ref.shape
    hidden = n4h // 4

    @pl.when(pl.program_id(1) == 0)          # time axis: new batch block
    def _():
        # LSTM called with hidden = None -> zero initial state.
        h_sc[...] = jnp.zeros_like(h_sc)
        c_sc[...] = jnp.zeros_like(c_sc)

    whh = whh_ref[...]                        # (H, 4H), compute dtype, resident
    bias = b_ref[...]                         # (1, 4H), f32

    def step(i, carry):
        h, c = carry
        # gates = (x-projection) + bias + h_{t-1} @ W_hh^T, all accumulated f32.
        gates = (gx_ref[i].astype(jnp.float32) + bias
                 + jnp.dot(h.astype(whh.dtype), whh,
                           preferred_element_type=jnp.float32))
        # Gate columns were pre-permuted to (i, f, o, g): one wide sigmoid over
        # (B, 3H) and one tanh over (B, H) -> fewer EUP ops per unrolled step.
        sig = jax.nn.sigmoid(gates[:, : 3 * hidden])
        i_g = sig[:, 0 * hidden:1 * hidden]
        f_g = sig[:, 1 * hidden:2 * hidden]
        o_g = sig[:, 2 * hidden:3 * hidden]
        g_g = jnp.tanh(gates[:, 3 * hidden:4 * hidden])

        c_new = f_g * c + i_g * g_g
        h_new = o_g * jnp.tanh(c_new)

        # Fused residual add on the way out.
        o_ref[i] = (h_new + res_ref[i]).astype(o_ref.dtype)
        return (h_new, c_new)

    h_fin, c_fin = lax.fori_loop(0, t_blk, step, (h_sc[...], c_sc[...]),
                                 unroll=True)
    h_sc[...] = h_fin
    c_sc[...] = c_fin


# ----------------------------------------------------------------------------
# Wrapper
# ----------------------------------------------------------------------------
def _to_ifog(w):
    """Permute PyTorch LSTM gate rows (i,f,g,o) -> (i,f,o,g) along axis 0."""
    i_g, f_g, g_g, o_g = jnp.split(w, 4, axis=0)
    return jnp.concatenate([i_g, f_g, o_g, g_g], axis=0)


def stage6_forward(input1, input3, input0, w_ih, w_hh, b_ih, b_hh,
                   *, compute_dtype=jnp.bfloat16, time_block=8,
                   batch_block=None):
    """input0/input1: (S, B, D); input3: (S, B, H). Returns (S, B, H) f32."""
    seq, bsz, d = input0.shape
    hidden = w_hh.shape[1]
    n4h = 4 * hidden
    assert w_ih.shape == (n4h, 2 * d)
    # f32 sublane constraint: makes the Phase-1 (T,B,D)->(T*B,D) reshape and
    # the per-step (B, H) layouts relayout-free.  Fail fast instead of silently
    # eating a VMEM-copy per block.
    assert bsz % 8 == 0, "batch must be a multiple of 8 (f32 sublane)"

    t_blk = _pick_time_block(seq, time_block)
    n_tblk = seq // t_blk

    # Batch blocking: set batch_block = B // 2 on v7x (2 TensorCores) with
    # B >= 128 so the "parallel" leading axis shards the recurrence; default
    # (full batch) is best on single-TC chips (v5e / v6e).
    b_blk = bsz if batch_block is None else int(batch_block)
    assert bsz % b_blk == 0 and b_blk % 8 == 0, "bad batch_block"
    n_bblk = bsz // b_blk

    # Weight prep (once, outside the kernels): gate-permute + split +
    # pre-transpose + cast.
    w_ih_p = _to_ifog(w_ih)                                     # (4H, 2D)
    w_hh_p = _to_ifog(w_hh)                                     # (4H, H)
    w0_t = jnp.asarray(w_ih_p[:, :d].T, dtype=compute_dtype)    # (D, 4H)
    w1_t = jnp.asarray(w_ih_p[:, d:].T, dtype=compute_dtype)    # (D, 4H)
    whh_t = jnp.asarray(w_hh_p.T, dtype=compute_dtype)          # (H, 4H)
    bias_p = _to_ifog(b_ih + b_hh).reshape(1, n4h).astype(jnp.float32)

    f32b = 4
    wb = jnp.dtype(compute_dtype).itemsize
    gx_dtype = compute_dtype                  # bf16 in production: halves the
    gxb = jnp.dtype(gx_dtype).itemsize        # dominant gates_x HBM stream.

    # ---- Phase 1: gates_x = X @ W_ih^T, for all timesteps --------------------
    proj_resident = (2 * 2 * t_blk * bsz * d * f32b     # x0, x1 (double-buf)
                     + 2 * d * n4h * wb                 # w0, w1 (single-buf)
                     + 2 * t_blk * bsz * n4h * gxb)     # gates_x out (double-buf)
    gates_x = pl.pallas_call(
        _input_proj_kernel,
        out_shape=jax.ShapeDtypeStruct((seq, bsz, n4h), gx_dtype),
        grid_spec=pltpu.PrefetchScalarGridSpec(
            num_scalar_prefetch=0,
            grid=(n_tblk,),
            in_specs=[
                pl.BlockSpec((t_blk, bsz, d), lambda t: (t, 0, 0)),   # input0
                pl.BlockSpec((t_blk, bsz, d), lambda t: (t, 0, 0)),   # input1
                _const_spec((d, n4h), lambda t: (0, 0)),              # W_ih[:,:D]^T
                _const_spec((d, n4h), lambda t: (0, 0)),              # W_ih[:,D:]^T
            ],
            out_specs=pl.BlockSpec((t_blk, bsz, n4h), lambda t: (t, 0, 0)),
        ),
        compiler_params=pltpu.CompilerParams(
            dimension_semantics=("parallel",),
            vmem_limit_bytes=_vmem_limit_bytes(proj_resident),
        ),
    )(input0, input1, w0_t, w1_t)

    # ---- Phase 2: recurrence over time (blocked) + residual add -------------
    rec_resident = (2 * t_blk * b_blk * n4h * gxb           # gates_x (double-buf)
                    + 2 * 2 * t_blk * b_blk * hidden * f32b  # residual + out
                    + hidden * n4h * wb                      # W_hh^T (single-buf)
                    + n4h * f32b                             # bias
                    + 2 * b_blk * hidden * f32b)             # h, c scratch
    out = pl.pallas_call(
        _lstm_recurrence_kernel,
        out_shape=jax.ShapeDtypeStruct((seq, bsz, hidden), jnp.float32),
        grid_spec=pltpu.PrefetchScalarGridSpec(
            num_scalar_prefetch=0,
            grid=(n_bblk, n_tblk),
            in_specs=[
                pl.BlockSpec((t_blk, b_blk, n4h),
                             lambda b, t: (t, b, 0)),                  # gates_x
                pl.BlockSpec((t_blk, b_blk, hidden),
                             lambda b, t: (t, b, 0)),                  # residual
                _const_spec((hidden, n4h), lambda b, t: (0, 0)),       # W_hh^T
                _const_spec((1, n4h), lambda b, t: (0, 0)),            # bias
            ],
            out_specs=pl.BlockSpec((t_blk, b_blk, hidden),
                                   lambda b, t: (t, b, 0)),
            scratch_shapes=[
                pltpu.VMEM((b_blk, hidden), jnp.float32),   # h state
                pltpu.VMEM((b_blk, hidden), jnp.float32),   # c state
            ],
        ),
        compiler_params=pltpu.CompilerParams(
            # batch blocks independent (-> v7x megacore); time is serial.
            dimension_semantics=("parallel", "arbitrary"),
            vmem_limit_bytes=_vmem_limit_bytes(rec_resident),
        ),
    )(gates_x, input3, whh_t, bias_p)
    return out


# ----------------------------------------------------------------------------
# Pure-JAX reference (lax.scan LSTM), f32 throughout.
# ----------------------------------------------------------------------------
def stage6_reference(input1, input3, input0, w_ih, w_hh, b_ih, b_hh):
    x = jnp.concatenate([input0, input1], axis=2)
    bsz = x.shape[1]
    hidden = w_hh.shape[1]
    bias = b_ih + b_hh

    def step(carry, xt):
        h, c = carry
        gates = xt @ w_ih.T + h @ w_hh.T + bias
        i_g, f_g, g_g, o_g = jnp.split(gates, 4, axis=-1)
        i_g = jax.nn.sigmoid(i_g)
        f_g = jax.nn.sigmoid(f_g)
        o_g = jax.nn.sigmoid(o_g)
        g_g = jnp.tanh(g_g)
        c = f_g * c + i_g * g_g
        h = o_g * jnp.tanh(c)
        return (h, c), h

    init = (jnp.zeros((bsz, hidden), jnp.float32),
            jnp.zeros((bsz, hidden), jnp.float32))
    _, hs = lax.scan(step, init, x)
    return hs + input3


if __name__ == "__main__":
    # Small shapes consistent with the module (real model: D=1024, H=1024,
    # concat -> 2048).  SEQ=16 with T_BLK=8 exercises the cross-grid-step
    # h/c carry; BATCH=16 with batch_block=8 exercises the 2-D (batch, time)
    # grid and the per-batch-block state re-init.
    SEQ, BATCH, D_HALF, HIDDEN = 16, 16, 128, 128

    key = jax.random.PRNGKey(0)
    k0, k1, k3, kwih, kwhh, kbih, kbhh = jax.random.split(key, 7)

    input0 = jax.random.normal(k0, (SEQ, BATCH, D_HALF), jnp.float32)
    input1 = jax.random.normal(k1, (SEQ, BATCH, D_HALF), jnp.float32)
    input3 = jax.random.normal(k3, (SEQ, BATCH, HIDDEN), jnp.float32)

    scale = 1.0 / jnp.sqrt(jnp.float32(HIDDEN))
    w_ih = jax.random.uniform(kwih, (4 * HIDDEN, 2 * D_HALF), jnp.float32,
                              -scale, scale)
    w_hh = jax.random.uniform(kwhh, (4 * HIDDEN, HIDDEN), jnp.float32,
                              -scale, scale)
    b_ih = jax.random.uniform(kbih, (4 * HIDDEN,), jnp.float32, -scale, scale)
    b_hh = jax.random.uniform(kbhh, (4 * HIDDEN,), jnp.float32, -scale, scale)

    ref = jax.block_until_ready(
        stage6_reference(input1, input3, input0, w_ih, w_hh, b_ih, b_hh))

    # f32 compute path, single batch block: strict check vs reference.
    out_f32 = jax.block_until_ready(
        stage6_forward(input1, input3, input0, w_ih, w_hh, b_ih, b_hh,
                       compute_dtype=jnp.float32))
    assert out_f32.shape == (SEQ, BATCH, HIDDEN)
    assert jnp.allclose(out_f32, ref, atol=1e-4, rtol=1e-4), \
        "f32 kernel mismatch vs reference"

    # f32 compute path, two batch blocks: strict check of the 2-D grid path
    # (per-batch-block h/c re-init keyed on the time program id).
    out_f32_split = jax.block_until_ready(
        stage6_forward(input1, input3, input0, w_ih, w_hh, b_ih, b_hh,
                       compute_dtype=jnp.float32, batch_block=8))
    assert jnp.allclose(out_f32_split, ref, atol=1e-4, rtol=1e-4), \
        "f32 batch-blocked kernel mismatch vs reference"

    # bf16 MXU path (production configuration: bf16 gates_x, f32 gate/cell
    # math): looser tolerance for the reduced-precision matmuls/storage.
    out_bf16 = jax.block_until_ready(
        stage6_forward(input1, input3, input0, w_ih, w_hh, b_ih, b_hh,
                       compute_dtype=jnp.bfloat16))
    assert out_bf16.shape == (SEQ, BATCH, HIDDEN)
    assert jnp.allclose(out_bf16, ref, atol=2e-1, rtol=2e-1), \
        "bf16 kernel mismatch vs reference"

    print("KERNEL_OK")
</pallas_src>

<mosaic_0001>
module attributes {stable_mosaic.version = 11 : i64} {
  func.func @_input_proj_kernel(%arg0: i32, %arg1: memref<8x16x128xf32, #tpu.memory_space<vmem>>, %arg2: memref<8x16x128xf32, #tpu.memory_space<vmem>>, %arg3: memref<128x512xf32, #tpu.memory_space<vmem>>, %arg4: memref<128x512xf32, #tpu.memory_space<vmem>>, %arg5: memref<8x16x512xf32, #tpu.memory_space<vmem>>) attributes {dimension_semantics = [#tpu.dimension_semantics<parallel>], iteration_bounds = array<i64: 2>, scalar_prefetch = 0 : i64, scratch_operands = 0 : i64, tpu.core_type = #tpu.core_type<tc>, window_params = [{transform_indices = @transform_0, window_bounds = array<i64: 8, 16, 128>}, {transform_indices = @transform_1, window_bounds = array<i64: 8, 16, 128>}, {pipeline_mode = #tpu.pipeline_mode<synchronous>, transform_indices = @transform_2, window_bounds = array<i64: 128, 512>}, {pipeline_mode = #tpu.pipeline_mode<synchronous>, transform_indices = @transform_3, window_bounds = array<i64: 128, 512>}, {transform_indices = @transform_4, window_bounds = array<i64: 8, 16, 512>}]} {
    %c0 = arith.constant 0 : index
    %c0_0 = arith.constant 0 : index
    %c0_1 = arith.constant 0 : index
    %0 = vector.load %arg1[%c0, %c0_0, %c0_1] : memref<8x16x128xf32, #tpu.memory_space<vmem>>, vector<8x16x128xf32>
    %1 = vector.shape_cast %0 : vector<8x16x128xf32> to vector<128x128xf32>
    %c0_2 = arith.constant 0 : index
    %c0_3 = arith.constant 0 : index
    %c0_4 = arith.constant 0 : index
    %2 = vector.load %arg2[%c0_2, %c0_3, %c0_4] : memref<8x16x128xf32, #tpu.memory_space<vmem>>, vector<8x16x128xf32>
    %3 = vector.shape_cast %2 : vector<8x16x128xf32> to vector<128x128xf32>
    %c0_5 = arith.constant 0 : index
    %c0_6 = arith.constant 0 : index
    %4 = vector.load %arg3[%c0_5, %c0_6] : memref<128x512xf32, #tpu.memory_space<vmem>>, vector<128x512xf32>
    %cst = arith.constant dense<0.000000e+00> : vector<128x512xf32>
    %5 = tpu.matmul %1, %4, %cst {dimension_numbers = #tpu.dot_dimension_numbers<[1], [0], [0], [1], [0, 0, 1, 1], [], []>} : vector<128x128xf32>, vector<128x512xf32>, vector<128x512xf32> -> vector<128x512xf32>
    %c0_7 = arith.constant 0 : index
    %c0_8 = arith.constant 0 : index
    %6 = vector.load %arg4[%c0_7, %c0_8] : memref<128x512xf32, #tpu.memory_space<vmem>>, vector<128x512xf32>
    %cst_9 = arith.constant dense<0.000000e+00> : vector<128x512xf32>
    %7 = tpu.matmul %3, %6, %cst_9 {dimension_numbers = #tpu.dot_dimension_numbers<[1], [0], [0], [1], [0, 0, 1, 1], [], []>} : vector<128x128xf32>, vector<128x512xf32>, vector<128x512xf32> -> vector<128x512xf32>
    %8 = arith.addf %5, %7 : vector<128x512xf32>
    %9 = vector.shape_cast %8 : vector<128x512xf32> to vector<8x16x512xf32>
    %c0_10 = arith.constant 0 : index
    %c0_11 = arith.constant 0 : index
    %c0_12 = arith.constant 0 : index
    %10 = vector.load %arg5[%c0_10, %c0_11, %c0_12] : memref<8x16x512xf32, #tpu.memory_space<vmem>>, vector<8x16x512xf32>
    tpu.vector_store %arg5[%c0_10, %c0_11, %c0_12], %9 {strides = array<i32>} : memref<8x16x512xf32, #tpu.memory_space<vmem>>, vector<8x16x512xf32>,
    return
  }
  func.func @transform_0(%arg0: i32) -> (i32, i32, i32) {
    %c0_i32 = arith.constant 0 : i32
    %c0_i32_0 = arith.constant 0 : i32
    %c0_i32_1 = arith.constant 0 : i32
    return %arg0, %c0_i32, %c0_i32_0 : i32, i32, i32
  }
  func.func @transform_1(%arg0: i32) -> (i32, i32, i32) {
    %c0_i32 = arith.constant 0 : i32
    %c0_i32_0 = arith.constant 0 : i32
    %c0_i32_1 = arith.constant 0 : i32
    return %arg0, %c0_i32, %c0_i32_0 : i32, i32, i32
  }
  func.func @transform_2(%arg0: i32) -> (i32, i32) {
    %c0_i32 = arith.constant 0 : i32
    %c0_i32_0 = arith.constant 0 : i32
    %c0_i32_1 = arith.constant 0 : i32
    return %c0_i32, %c0_i32_0 : i32, i32
  }
  func.func @transform_3(%arg0: i32) -> (i32, i32) {
    %c0_i32 = arith.constant 0 : i32
    %c0_i32_0 = arith.constant 0 : i32
    %c0_i32_1 = arith.constant 0 : i32
    return %c0_i32, %c0_i32_0 : i32, i32
  }
  func.func @transform_4(%arg0: i32) -> (i32, i32, i32) {
    %c0_i32 = arith.constant 0 : i32
    %c0_i32_0 = arith.constant 0 : i32
    %c0_i32_1 = arith.constant 0 : i32
    return %arg0, %c0_i32, %c0_i32_0 : i32, i32, i32
  }
}

</mosaic_0001>

<bundles_post_ra>
// kernel: tpu_custom_call.1
= control target key start
LH: loop header
LB: loop body
LE: loop exit
PB: predicated region body
PF: predicated region fallthrough
CT: control target
= control target key end

     0   :  { %s2228_s0 = inlined_call_operand.hbm [shape: f32[16,16,128], index: 0, kind: input, shape index: {}]   ;;  %s2229_s1 = inlined_call_operand.hbm [shape: f32[16,16,128], index: 1, kind: input, shape index: {}]   ;;  %s2230_s2 = inlined_call_operand.hbm [shape: f32[128,512], index: 2, kind: input, shape index: {}]   ;;  %s2231_s3 = inlined_call_operand.hbm [shape: f32[128,512], index: 3, kind: input, shape index: {}]   ;;  %s2232_s4 = inlined_call_operand.hbm [shape: f32[16,16,512], index: 4, kind: output, shape index: {}]  }
   0x1   :  { %2236 = sst [smem:[#allocation26_spill]] %s2228_s0 }
   0x2   :  { %9 = vsyncpa [#allocation3], 0 }
   0x3   :  { %11 = vsyncpa [#allocation3 + $0x1], 0 }
   0x4   :  { %12 = vsyncpa [#allocation6], 0 }
   0x5   :  { %14 = vsyncpa [#allocation6 + $0x1], 0 }
   0x6   :  { %15 = vsyncpa [#allocation9], 0 }
   0x7   :  { %16 = vsyncpa [#allocation4], 0 }
   0x8   :  { %18 = vsyncpa [#allocation4 + $0x1], 0  ;;  %s1621_s15 = smov 0   ;;  %s1623_s16 = smov 0  }
   0x9   :  { %s1625_s17 = smov 0   ;;  %s1627_s18 = smov 0  }
   0xa LB: > { %s1642_s19 = sadd.s32 4294967295, %s1582_s18   ;;  %s1288_s20 = sadd.s32 4294967294, %s1582_s18   ;;  %s1582_s18 = sphi %s1627_s18, %s2276_s18   ;;  %s1578_s17 = sphi %s1625_s17, %s2275_s17   ;;  %s1574_s16 = sphi %s1623_s16, %s2274_s16   ;;  %s1570_s15 = sphi %s1621_s15, %s2273_s15  }
   0xb   : > { %p44_p0 = scmp.ne.s32.totalorder %s1574_s16, %s1570_s15  ;;  %p2233_p1 = scmp.eq.s32.totalorder %s1642_s19, 0 }
   0xc   : > { %p142_p3 = scmp.eq.s32.totalorder %s1288_s20, 1  ;;  %p1289_p5 = scmp.ge.s32.totalorder %s1582_s18, 1 }
   0xd   : > { %p1651_p4 = por %p2233_p1, %p44_p0  ;;  %p149_p7 = scmp.lt.s32.totalorder %s1582_s18, 3 }
   0xe   : > { %p1656_p6 = por %p142_p3, %p44_p0  ;;  %s1584_s24 = smov [#allocation7]  }
   0xf   : > { %s2237_s21 = scalar_select %p1651_p4, 1, 0 }
  0x10   : > { %s2238_s22 = scalar_select %p1656_p6, 1, 0 }
  0x11   : > { %p1661_p8 = pnand %p1289_p5, %p149_p7  ;;  %s161_s25 = sshll.u32 %s1584_s24, 4  ;;  %s162_s25 = int_to_ptr.vmem [resolvable:$true] %s161_s25 }
  0x12   : > { %s1585_s27 = smov [#allocation8]   ;;  %s1409_s29 = scalar_lea.vmem %s162_s25, 8192 }
  0x13   : > { %p1333_p9 = pneg %p1661_p8  ;;  %s174_s28 = sshll.u32 %s1585_s27, 4  ;;  %s175_s28 = int_to_ptr.vmem [resolvable:$true] %s174_s28 }
  0x14   : > { %p1410_p13 = scmp.ne.s32.totalorder %s162_s25, %s1409_s29  ;;  %p1417_p5 = scmp.lt.s32.totalorder %s162_s25, %s162_s25 }
  0x15   : > { %p1670_p11 = pnand %p1333_p9, %p2233_p1  ;;  %p1418_p7 = scmp.lt.s32.totalorder %s1409_s29, %s1409_s29 }
  0x17   : > { %p1400_p12 = pneg %p1670_p11  ;;  %p1419_p10 = por %p1418_p7, %p1417_p5 }
  0x19   : > { %p1412_p0 = pnand %p1410_p13, %p1400_p12 }
  0x1b   : > { %p1413_p3 = pneg %p1412_p0 }
  0x1d   : > { %p1420_p9 = pnand %p1419_p10, %p1413_p3 }
  0x1f   : > { %1423 = shalt.err (!%p1420_p9)
}
  0x20   : > { %s1586_s30 = smov 512   ;;  %s1587_s5 = smov 32  }
  0x21   : > { %1336 = dma.hbm_to_vmem [thread:$0]  (!%p1670_p11), %s2230_s2, 8192, %s162_s25, [#allocation6], %s1586_s30, %s1586_s30, %s1587_s5  }
  0x22   : > { %s1435_s8 = scalar_lea.vmem %s175_s28, 8192  ;;  %p1443_p2 = scmp.lt.s32.totalorder %s175_s28, %s175_s28 }
  0x23   : > { %p1436_p1 = scmp.ne.s32.totalorder %s175_s28, %s1435_s8  ;;  %p1444_p6 = scmp.lt.s32.totalorder %s1435_s8, %s1435_s8 }
  0x25   : > { %p1438_p13 = pnand %p1436_p1, %p1400_p12  ;;  %p1445_p5 = por %p1444_p6, %p1443_p2 }
  0x27   : > { %p1439_p0 = pneg %p1438_p13 }
  0x29   : > { %p1446_p10 = pnand %p1445_p5, %p1439_p0 }
  0x2b   : > { %1449 = shalt.err (!%p1446_p10)
}
  0x2c   : > { %1339 = dma.hbm_to_vmem [thread:$0]  (!%p1670_p11), %s2231_s3, 8192, %s175_s28, [#allocation9], %s1586_s30, %s1586_s30, %s1587_s5  }
  0x2d   : > { %s1693_s11 = sadd.s32 1, %s1582_s18   ;;  %s31_s12 = sadd.s32 1, %s1578_s17 }
  0x2e   : > { %s28_s13 = ssub.s32 %s1582_s18, %s1693_s11  ;;  %p38_p1 = scmp.ne.s32.totalorder %s1578_s17, %s1574_s16 }
  0x2f   : > { %p29_p2 = scmp.eq.s32.totalorder %s28_s13, 0  ;;  %p39_p6 = scmp.eq.s32.totalorder %s1582_s18, 0 }
  0x30   : > { %p2241_p12 = scmp.eq.s32.totalorder %s1642_s19, 1  ;;  %p1353_p7 = scmp.lt.s32.totalorder %s1582_s18, 2 }
  0x31   : > { %s1709_s20 = scalar_select %p29_p2, %s1578_s17, %s31_s12  }
  0x32   : > { %p1703_p3 = por %p2241_p12, %p38_p1  ;;  %p40_p9 = por %p39_p6, %p38_p1 }
  0x33   : > { %s188_s24 = sand.u32 1, %s1578_s17   ;;  %s1314_s26 = sshll.u32 %s1582_s18, 11 }
  0x34   : > { %s2242_s14 = scalar_select %p1703_p3, 1, 0 }
  0x35   : > { %s1712_s25 = sshll.u32 %s188_s24, 7  ;;  %s2243_s0 = sld [smem:[#allocation26_spill]] }
  0x36   : > { %s192_s30 = scalar_lea.vmem [#allocation2], %s1712_s25  ;;  %p1725_p11 = pnand %p1353_p7, %p40_p9 }
  0x37   : > { %s200_s5 = sshll.u32 %s192_s30, 4  ;;  %s1729_s7 = scalar_lea.sflag [#allocation3], %s188_s24  ;;  %s1723_s5 = int_to_ptr.vmem [resolvable:$true] %s200_s5 }
  0x38   : > { %p1452_p0 = pneg %p1725_p11 }
  0x3b   : > { %s1720_s29 = scalar_lea.hbm %s2243_s0, %s1314_s26  ;;  %s1455_s12 = scalar_lea.hbm %s2243_s0, 4096 }
  0x3c   : > { %s1450_s8 = scalar_lea.hbm %s1720_s29, 2048  ;;  %p1456_p1 = scmp.lt.s32.totalorder %s1720_s29, %s2243_s0 }
  0x3d   : > { %p1451_p13 = scmp.ne.s32.totalorder %s1720_s29, %s1450_s8  ;;  %p1457_p2 = scmp.lt.s32.totalorder %s1455_s12, %s1450_s8 }
  0x3f   : > { %p1453_p5 = pnand %p1452_p0, %p1451_p13  ;;  %p1458_p6 = por %p1457_p2, %p1456_p1 }
  0x41   : > { %p1454_p10 = pneg %p1453_p5 }
  0x43   : > { %p1459_p12 = pnand %p1458_p6, %p1454_p10 }
  0x45   : > { %1462 = shalt.err (!%p1459_p12)
}
  0x46   : > { %s1463_s24 = scalar_lea.vmem %s1723_s5, 2048  ;;  %s1588_s28 = smov [#allocation2]  }
  0x47   : > { %p1464_p7 = scmp.ne.s32.totalorder %s1723_s5, %s1463_s24  ;;  %s1468_s30 = sshll.u32 %s1588_s28, 4  ;;  %s1469_s30 = int_to_ptr.vmem [resolvable:$false] %s1468_s30 }
  0x48   : > { %s1470_s9 = scalar_lea.vmem %s1469_s30, 4096  ;;  %p1471_p5 = scmp.lt.s32.totalorder %s1723_s5, %s1469_s30 }
  0x49   : > { %p1466_p9 = pnand %p1464_p7, %p1452_p0  ;;  %p1472_p3 = scmp.lt.s32.totalorder %s1470_s9, %s1463_s24 }
  0x4b   : > { %p1467_p13 = pneg %p1466_p9  ;;  %p1473_p4 = por %p1472_p3, %p1471_p5 }
  0x4d   : > { %p1474_p1 = pnand %p1473_p4, %p1467_p13 }
  0x4f   : > { %1477 = shalt.err (!%p1474_p1)
}
  0x50   : > { %s1589_s8 = smov 128   ;;  %s1590_s10 = smov 8  }
  0x51   : > { %1343 = dma.hbm_to_vmem [thread:$0]  (!%p1725_p11), %s1720_s29, 2048, %s1723_s5, %s1729_s7, %s1589_s8, %s1589_s8, %s1590_s10  }
  0x52   : > { %s1764_s27 = scalar_lea.hbm %s2229_s1, %s1314_s26  ;;  %s214_s24 = scalar_lea.vmem [#allocation5], %s1712_s25 }
  0x53   : > { %s222_s28 = sshll.u32 %s214_s24, 4  ;;  %s210_s30 = sand.u32 1, %s1582_s18   ;;  %s1767_s28 = int_to_ptr.vmem [resolvable:$true] %s222_s28 }
  0x54   : > { %s211_s9 = scalar_lea.sflag [#allocation6], %s210_s30  ;;  %s1478_s0 = scalar_lea.hbm %s1764_s27, 2048 }
  0x55   : > { %p1479_p4 = scmp.ne.s32.totalorder %s1764_s27, %s1478_s0  ;;  %s1483_s26 = scalar_lea.hbm %s2229_s1, 4096 }
  0x56   : > { %p1484_p2 = scmp.lt.s32.totalorder %s1764_s27, %s2229_s1  ;;  %p1485_p6 = scmp.lt.s32.totalorder %s1483_s26, %s1478_s0 }
  0x57   : > { %p1481_p3 = pnand %p1479_p4, %p1452_p0 }
  0x58   : > { %p1486_p12 = por %p1485_p6, %p1484_p2 }
  0x59   : > { %p1482_p10 = pneg %p1481_p3 }
  0x5b   : > { %p1487_p7 = pnand %p1486_p12, %p1482_p10 }
  0x5d   : > { %1490 = shalt.err (!%p1487_p7)
}
  0x5e   : > { %s1491_s25 = scalar_lea.vmem %s1767_s28, 2048  ;;  %s1591_s13 = smov [#allocation5]  }
  0x5f   : > { %p1492_p9 = scmp.ne.s32.totalorder %s1767_s28, %s1491_s25  ;;  %s1496_s24 = sshll.u32 %s1591_s13, 4  ;;  %s1497_s24 = int_to_ptr.vmem [resolvable:$false] %s1496_s24 }
  0x60   : > { %s1498_s30 = scalar_lea.vmem %s1497_s24, 4096  ;;  %p1499_p1 = scmp.lt.s32.totalorder %s1767_s28, %s1497_s24 }
  0x61   : > { %p1494_p13 = pnand %p1492_p9, %p1452_p0  ;;  %p1500_p4 = scmp.lt.s32.totalorder %s1498_s30, %s1491_s25 }
  0x63   : > { %p1495_p5 = pneg %p1494_p13  ;;  %p1501_p3 = por %p1500_p4, %p1499_p1 }
  0x65   : > { %p1502_p2 = pnand %p1501_p3, %p1495_p5 }
  0x67   : > { %1505 = shalt.err (!%p1502_p2)
}
  0x68   : > { %1346 = dma.hbm_to_vmem [thread:$0]  (!%p1725_p11), %s1764_s27, 2048, %s1767_s28, %s211_s9, %s1589_s8, %s1589_s8, %s1590_s10  }
  0x69   : > { %234 = sbr.rel (%p1661_p8) target bundleno = 492 (0x1ec), region = 36 }
  0x6e   : > { %s1798_s0 = sand.u32 1, %s1574_s16   ;;  %p2245_p0 = scmp.ne.s32.totalorder %s2237_s21, 0 }
  0x6f   : > { %s1302_s29 = sshll.u32 %s1798_s0, 7  ;;  %s237_s5 = scalar_lea.sflag [#allocation3], %s1798_s0 }
  0x70   : > { %s1802_s26 = scalar_lea.vmem [#allocation2], %s1302_s29 }
  0x71   : > { %1549 = dma.done.wait (%p2245_p0), %s237_s5, 2048  }
  0x72   : > { %1551 = vsyncadd (%p2245_p0), %s237_s5, 4294965248  ;;  %s245_s6 = sand.u32 1, %s1642_s19   ;;  %s1809_s8 = scalar_lea.vmem [#allocation5], %s1302_s29 }
  0x73   : > { %s246_s23 = scalar_lea.sflag [#allocation6], %s245_s6 }
  0x74   : > { %1553 = dma.done.wait (%p2245_p0), %s246_s23, 2048  }
  0x75   : > { %1555 = vsyncadd (%p2245_p0), %s246_s23, 4294965248  ;;  %p2246_p8 = scmp.eq.s32.totalorder %s1642_s19, 0 }
  0x77   : > { %1557 = dma.done.wait (%p2246_p8), [#allocation6], 8192   ;;  %p2247_p11 = pmov %p2246_p8 }
  0x78   : > { %p2248_p10 = pmov %p2246_p8 }
  0x79   : > { %1559 = vsyncadd (%p2247_p11), [#allocation6], 4294959104 }
  0x7a   : > { %1561 = dma.done.wait (%p2248_p10), [#allocation9], 8192   ;;  %p2249_p6 = pmov %p2246_p8 }
  0x7b   : > { %v1592_v0 = vmov 0.0   ;;  %v447_v1 = vld [vmem:[#allocation8 + $0x1e8] sm:$0xff]  ;;  %v449_v2 = vld [vmem:[#allocation8 + $0x1f8] sm:$0xff]  ;;  %v446_v3 = vld [vmem:[#allocation8 + $0x1e0] sm:$0xff]  ;;  %s1306_s21 = sshll.u32 %s1798_s0, 9  ;;  %s1318_s27 = sshll.u32 %s1642_s19, 13 }
  0x7c   : > { %1563 = vsyncadd (%p2249_p6), [#allocation9], 4294959104  ;;  %514 = vmatprep.mubr.f32.mxu0 %v1592_v0  ;;  %675 = vmatprep.mubr.f32.mxu1 %v1592_v0  ;;  %v448_v4 = vld [vmem:[#allocation8 + $0x1f0] sm:$0xff]  ;;  %v443_v5 = vld [vmem:[#allocation8 + $0x1c8] sm:$0xff]  ;;  %s2050_s10 = scalar_lea.vmem [#allocation10], %s1306_s21  ;;  %s2177_s12 = scalar_lea.hbm %s2232_s4, %s1318_s27 }
  0x7d   : > { %450 = vmatprep.subr.mxu0 %v447_v1  ;;  %611 = vmatprep.subr.mxu1 %v449_v2  ;;  %v445_v6 = vld [vmem:[#allocation8 + $0x1d8] sm:$0xff]  ;;  %v442_v7 = vld [vmem:[#allocation8 + $0x1c0] sm:$0xff]  ;;  %v444_v8 = vld [vmem:[#allocation8 + $0x1d0] sm:$0xff]  ;;  %s1173_s28 = sshll.u32 %s2050_s10, 4  ;;  %s1159_s19 = scalar_lea.sflag [#allocation4], %s1798_s0  ;;  %s2179_s28 = int_to_ptr.vmem [resolvable:$true] %s1173_s28 }
  0x7e   : > { %451 = vmatpush1.msra.mxu0 %v446_v3  ;;  %612 = vmatpush1.msra.mxu1 %v448_v4  ;;  %v439_v9 = vld [vmem:[#allocation8 + $0x1a8] sm:$0xff]  ;;  %v441_v10 = vld [vmem:[#allocation8 + $0x1b8] sm:$0xff]  ;;  %v438_v11 = vld [vmem:[#allocation8 + $0x1a0] sm:$0xff]  ;;  %s1506_s25 = scalar_lea.vmem %s2179_s28, 8192  ;;  %p2270_p7 = scmp.ne.s32.totalorder %s2242_s14, 0 }
  0x7f   : > { %452 = vmatprep.subr.mxu0 %v443_v5  ;;  %613 = vmatprep.subr.mxu1 %v445_v6  ;;  %v440_v12 = vld [vmem:[#allocation8 + $0x1b0] sm:$0xff]  ;;  %v435_v13 = vld [vmem:[#allocation8 + $0x188] sm:$0xff]  ;;  %v437_v14 = vld [vmem:[#allocation8 + $0x198] sm:$0xff]  ;;  %p1507_p12 = scmp.ne.s32.totalorder %s2179_s28, %s1506_s25  ;;  %s1593_s13 = smov [#allocation10]  }
  0x80   : > { %453 = vmatpush1.msra.mxu0 %v442_v7  ;;  %614 = vmatpush1.msra.mxu1 %v444_v8  ;;  %v434_v15 = vld [vmem:[#allocation8 + $0x180] sm:$0xff]  ;;  %v436_v16 = vld [vmem:[#allocation8 + $0x190] sm:$0xff]  ;;  %v431_v17 = vld [vmem:[#allocation8 + $0x168] sm:$0xff]  ;;  %s1510_s24 = sshll.u32 %s1593_s13, 4  ;;  %s1511_s24 = int_to_ptr.vmem [resolvable:$false] %s1510_s24 }
  0x81   : > { %454 = vmatprep.subr.mxu0 %v439_v9  ;;  %615 = vmatprep.subr.mxu1 %v441_v10  ;;  %v433_v18 = vld [vmem:[#allocation8 + $0x178] sm:$0xff]  ;;  %v430_v19 = vld [vmem:[#allocation8 + $0x160] sm:$0xff]  ;;  %v432_v20 = vld [vmem:[#allocation8 + $0x170] sm:$0xff]  ;;  %p1508_p9 = pnand %p1507_p12, %p2270_p7  ;;  %s1512_s30 = scalar_lea.vmem %s1511_s24, 16384 }
  0x82   : > { %455 = vmatpush1.msra.mxu0 %v438_v11  ;;  %616 = vmatpush1.msra.mxu1 %v440_v12  ;;  %v427_v21 = vld [vmem:[#allocation8 + $0x148] sm:$0xff]  ;;  %v429_v22 = vld [vmem:[#allocation8 + $0x158] sm:$0xff]  ;;  %v426_v23 = vld [vmem:[#allocation8 + $0x140] sm:$0xff]  ;;  %p1513_p5 = scmp.lt.s32.totalorder %s2179_s28, %s1511_s24  ;;  %p1514_p1 = scmp.lt.s32.totalorder %s1512_s30, %s1506_s25 }
  0x83   : > { %456 = vmatprep.subr.mxu0 %v435_v13  ;;  %617 = vmatprep.subr.mxu1 %v437_v14  ;;  %v428_v24 = vld [vmem:[#allocation8 + $0x150] sm:$0xff]  ;;  %v423_v25 = vld [vmem:[#allocation8 + $0x128] sm:$0xff]  ;;  %v425_v26 = vld [vmem:[#allocation8 + $0x138] sm:$0xff]  ;;  %p1509_p13 = pneg %p1508_p9 }
  0x84   : > { %457 = vmatpush1.msra.mxu0 %v434_v15  ;;  %618 = vmatpush1.msra.mxu1 %v436_v16  ;;  %v422_v27 = vld [vmem:[#allocation8 + $0x120] sm:$0xff]  ;;  %v424_v28 = vld [vmem:[#allocation8 + $0x130] sm:$0xff]  ;;  %v419_v29 = vld [vmem:[#allocation8 + $0x108] sm:$0xff]  ;;  %p1515_p4 = por %p1514_p1, %p1513_p5 }
  0x85   : > { %458 = vmatprep.subr.mxu0 %v431_v17  ;;  %619 = vmatprep.subr.mxu1 %v433_v18  ;;  %v421_v30 = vld [vmem:[#allocation8 + $0x118] sm:$0xff]  ;;  %v418_v31 = vld [vmem:[#allocation8 + $0x100] sm:$0xff]  ;;  %v420_v32 = vld [vmem:[#allocation8 + $0x110] sm:$0xff] }
  0x86   : > { %459 = vmatpush1.msra.mxu0 %v430_v19  ;;  %620 = vmatpush1.msra.mxu1 %v432_v20  ;;  %v415_v33 = vld [vmem:[#allocation8 + $0xe8] sm:$0xff]  ;;  %v417_v34 = vld [vmem:[#allocation8 + $0xf8] sm:$0xff]  ;;  %v414_v35 = vld [vmem:[#allocation8 + $0xe0] sm:$0xff]  ;;  %p1516_p3 = pnand %p1515_p4, %p1509_p13 }
  0x87   : > { %460 = vmatprep.subr.mxu0 %v427_v21  ;;  %621 = vmatprep.subr.mxu1 %v429_v22  ;;  %v416_v36 = vld [vmem:[#allocation8 + $0xf0] sm:$0xff]  ;;  %v411_v37 = vld [vmem:[#allocation8 + $0xc8] sm:$0xff]  ;;  %v413_v38 = vld [vmem:[#allocation8 + $0xd8] sm:$0xff] }
  0x88   : > { %461 = vmatpush1.msra.mxu0 %v426_v23  ;;  %622 = vmatpush1.msra.mxu1 %v428_v24  ;;  %v410_v39 = vld [vmem:[#allocation8 + $0xc0] sm:$0xff]  ;;  %v412_v40 = vld [vmem:[#allocation8 + $0xd0] sm:$0xff]  ;;  %v407_v41 = vld [vmem:[#allocation8 + $0xa8] sm:$0xff] }
  0x89   : > { %462 = vmatprep.subr.mxu0 %v423_v25  ;;  %623 = vmatprep.subr.mxu1 %v425_v26  ;;  %v409_v42 = vld [vmem:[#allocation8 + $0xb8] sm:$0xff]  ;;  %v406_v43 = vld [vmem:[#allocation8 + $0xa0] sm:$0xff]  ;;  %v408_v44 = vld [vmem:[#allocation8 + $0xb0] sm:$0xff] }
  0x8a   : > { %463 = vmatpush1.msra.mxu0 %v422_v27  ;;  %624 = vmatpush1.msra.mxu1 %v424_v28  ;;  %v403_v45 = vld [vmem:[#allocation8 + $0x88] sm:$0xff]  ;;  %v405_v46 = vld [vmem:[#allocation8 + $0x98] sm:$0xff]  ;;  %v402_v47 = vld [vmem:[#allocation8 + $0x80] sm:$0xff] }
  0x8b   : > { %464 = vmatprep.subr.mxu0 %v419_v29  ;;  %625 = vmatprep.subr.mxu1 %v421_v30  ;;  %v404_v48 = vld [vmem:[#allocation8 + $0x90] sm:$0xff]  ;;  %v399_v49 = vld [vmem:[#allocation8 + $0x68] sm:$0xff]  ;;  %v401_v50 = vld [vmem:[#allocation8 + $0x78] sm:$0xff] }
  0x8c   : > { %465 = vmatpush1.msra.mxu0 %v418_v31  ;;  %626 = vmatpush1.msra.mxu1 %v420_v32  ;;  %v398_v51 = vld [vmem:[#allocation8 + $0x60] sm:$0xff]  ;;  %v400_v52 = vld [vmem:[#allocation8 + $0x70] sm:$0xff]  ;;  %v395_v53 = vld [vmem:[#allocation8 + $0x48] sm:$0xff] }
  0x8d   : > { %466 = vmatprep.subr.mxu0 %v415_v33  ;;  %627 = vmatprep.subr.mxu1 %v417_v34  ;;  %v397_v54 = vld [vmem:[#allocation8 + $0x58] sm:$0xff]  ;;  %v394_v55 = vld [vmem:[#allocation8 + $0x40] sm:$0xff]  ;;  %v396_v56 = vld [vmem:[#allocation8 + $0x50] sm:$0xff] }
  0x8e   : > { %467 = vmatpush1.msra.mxu0 %v414_v35  ;;  %628 = vmatpush1.msra.mxu1 %v416_v36  ;;  %v391_v57 = vld [vmem:[#allocation8 + $0x28] sm:$0xff]  ;;  %v393_v58 = vld [vmem:[#allocation8 + $0x38] sm:$0xff]  ;;  %v390_v59 = vld [vmem:[#allocation8 + $0x20] sm:$0xff] }
  0x8f   : > { %468 = vmatprep.subr.mxu0 %v411_v37  ;;  %629 = vmatprep.subr.mxu1 %v413_v38  ;;  %v392_v60 = vld [vmem:[#allocation8 + $0x30] sm:$0xff]  ;;  %v387_v61 = vld [vmem:[#allocation8 + $0x8] sm:$0xff]  ;;  %v389_v62 = vld [vmem:[#allocation8 + $0x18] sm:$0xff] }
  0x90   : > { %469 = vmatpush1.msra.mxu0 %v410_v39  ;;  %630 = vmatpush1.msra.mxu1 %v412_v40  ;;  %v386_v63 = vld [vmem:[#allocation8] sm:$0xff]  ;;  %v388_v1 = vld [vmem:[#allocation8 + $0x10] sm:$0xff]  ;;  %v383_v3 = vld [vmem:[#allocation7 + $0x1e8] sm:$0xff] }
  0x91   : > { %470 = vmatprep.subr.mxu0 %v407_v41  ;;  %631 = vmatprep.subr.mxu1 %v409_v42  ;;  %v306_v2 = vld [vmem:[%s1809_s8] sm:$0xff]  ;;  %v385_v4 = vld [vmem:[#allocation7 + $0x1f8] sm:$0xff]  ;;  %v384_v6 = vld [vmem:[#allocation7 + $0x1f0] sm:$0xff] }
  0x92   : > { %471 = vmatpush1.msra.mxu0 %v406_v43  ;;  %632 = vmatpush1.msra.mxu1 %v408_v44  ;;  %v382_v5 = vld [vmem:[#allocation7 + $0x1e0] sm:$0xff]  ;;  %v307_v7 = vld [vmem:[%s1809_s8 + $0x8] sm:$0xff]  ;;  %v381_v9 = vld [vmem:[#allocation7 + $0x1d8] sm:$0xff] }
  0x93   : > { %472 = vmatprep.subr.mxu0 %v403_v45  ;;  %633 = vmatprep.subr.mxu1 %v405_v46  ;;  %v379_v8 = vld [vmem:[#allocation7 + $0x1c8] sm:$0xff]  ;;  %v378_v10 = vld [vmem:[#allocation7 + $0x1c0] sm:$0xff]  ;;  %v380_v11 = vld [vmem:[#allocation7 + $0x1d0] sm:$0xff] }
  0x94   : > { %473 = vmatpush1.msra.mxu0 %v402_v47  ;;  %634 = vmatpush1.msra.mxu1 %v404_v48  ;;  %v308_v12 = vld [vmem:[%s1809_s8 + $0x10] sm:$0xff]  ;;  %v375_v13 = vld [vmem:[#allocation7 + $0x1a8] sm:$0xff]  ;;  %v377_v14 = vld [vmem:[#allocation7 + $0x1b8] sm:$0xff] }
  0x95   : > { %474 = vmatprep.subr.mxu0 %v399_v49  ;;  %635 = vmatprep.subr.mxu1 %v401_v50  ;;  %v374_v15 = vld [vmem:[#allocation7 + $0x1a0] sm:$0xff]  ;;  %v376_v16 = vld [vmem:[#allocation7 + $0x1b0] sm:$0xff]  ;;  %v309_v17 = vld [vmem:[%s1809_s8 + $0x18] sm:$0xff] }
  0x96   : > { %475 = vmatpush1.msra.mxu0 %v398_v51  ;;  %636 = vmatpush1.msra.mxu1 %v400_v52  ;;  %v371_v18 = vld [vmem:[#allocation7 + $0x188] sm:$0xff]  ;;  %v373_v19 = vld [vmem:[#allocation7 + $0x198] sm:$0xff]  ;;  %v370_v20 = vld [vmem:[#allocation7 + $0x180] sm:$0xff] }
  0x97   : > { %476 = vmatprep.subr.mxu0 %v395_v53  ;;  %637 = vmatprep.subr.mxu1 %v397_v54  ;;  %v372_v21 = vld [vmem:[#allocation7 + $0x190] sm:$0xff]  ;;  %v310_v22 = vld [vmem:[%s1809_s8 + $0x20] sm:$0xff]  ;;  %v367_v23 = vld [vmem:[#allocation7 + $0x168] sm:$0xff] }
  0x98   : > { %477 = vmatpush1.msra.mxu0 %v394_v55  ;;  %638 = vmatpush1.msra.mxu1 %v396_v56  ;;  %v369_v24 = vld [vmem:[#allocation7 + $0x178] sm:$0xff]  ;;  %v366_v25 = vld [vmem:[#allocation7 + $0x160] sm:$0xff]  ;;  %v368_v26 = vld [vmem:[#allocation7 + $0x170] sm:$0xff] }
  0x99   : > { %478 = vmatprep.subr.mxu0 %v391_v57  ;;  %639 = vmatprep.subr.mxu1 %v393_v58  ;;  %v311_v27 = vld [vmem:[%s1809_s8 + $0x28] sm:$0xff]  ;;  %v365_v29 = vld [vmem:[#allocation7 + $0x158] sm:$0xff]  ;;  %v362_v30 = vld [vmem:[#allocation7 + $0x140] sm:$0xff] }
  0x9a   : > { %479 = vmatpush1.msra.mxu0 %v390_v59  ;;  %640 = vmatpush1.msra.mxu1 %v392_v60  ;;  %v363_v28 = vld [vmem:[#allocation7 + $0x148] sm:$0xff]  ;;  %v364_v31 = vld [vmem:[#allocation7 + $0x150] sm:$0xff]  ;;  %v361_v34 = vld [vmem:[#allocation7 + $0x138] sm:$0xff] }
  0x9b   : > { %480 = vmatprep.subr.mxu0 %v387_v61  ;;  %641 = vmatprep.subr.mxu1 %v389_v62  ;;  %v312_v32 = vld [vmem:[%s1809_s8 + $0x30] sm:$0xff]  ;;  %v359_v33 = vld [vmem:[#allocation7 + $0x128] sm:$0xff]  ;;  %v358_v35 = vld [vmem:[#allocation7 + $0x120] sm:$0xff] }
  0x9c   : > { %481 = vmatpush1.msra.mxu0 %v386_v63  ;;  %642 = vmatpush1.msra.mxu1 %v388_v1  ;;  %v360_v36 = vld [vmem:[#allocation7 + $0x130] sm:$0xff]  ;;  %v313_v37 = vld [vmem:[%s1809_s8 + $0x38] sm:$0xff]  ;;  %v355_v38 = vld [vmem:[#allocation7 + $0x108] sm:$0xff] }
  0x9d   : > { %515 = vmatmul.mubr.f32.vlgmr.msra.gmra.mxu0 %v306_v2  ;;  %676 = vmatmul.mubr.f32.vlgmr.msra.gmra.mxu1 %v306_v2  ;;  %v357_v39 = vld [vmem:[#allocation7 + $0x118] sm:$0xff]  ;;  %v354_v40 = vld [vmem:[#allocation7 + $0x100] sm:$0xff]  ;;  %v356_v41 = vld [vmem:[#allocation7 + $0x110] sm:$0xff] }
  0x9e   : > { %772 = vmatprep.subr.mxu0 %v383_v3  ;;  %933 = vmatprep.subr.mxu1 %v385_v4  ;;  %v314_v42 = vld [vmem:[%s1809_s8 + $0x40] sm:$0xff]  ;;  %v351_v43 = vld [vmem:[#allocation7 + $0xe8] sm:$0xff]  ;;  %v353_v44 = vld [vmem:[#allocation7 + $0xf8] sm:$0xff] }
  0x9f   : > { %773 = vmatpush1.msra.mxu0 %v382_v5  ;;  %934 = vmatpush1.msra.mxu1 %v384_v6  ;;  %v350_v45 = vld [vmem:[#allocation7 + $0xe0] sm:$0xff]  ;;  %v352_v46 = vld [vmem:[#allocation7 + $0xf0] sm:$0xff]  ;;  %v315_v47 = vld [vmem:[%s1809_s8 + $0x48] sm:$0xff] }
  0xa0   : > { %520 = vmatprep.mubr.f32.mxu0 %v1592_v0  ;;  %681 = vmatprep.mubr.f32.mxu1 %v1592_v0  ;;  %v347_v48 = vld [vmem:[#allocation7 + $0xc8] sm:$0xff]  ;;  %v349_v49 = vld [vmem:[#allocation7 + $0xd8] sm:$0xff]  ;;  %v346_v50 = vld [vmem:[#allocation7 + $0xc0] sm:$0xff] }
  0xa1   : > { %521 = vmatmul.mubr.f32.gmra.mxu0 %v307_v7  ;;  %682 = vmatmul.mubr.f32.gmra.mxu1 %v307_v7  ;;  %v348_v51 = vld [vmem:[#allocation7 + $0xd0] sm:$0xff]  ;;  %v343_v53 = vld [vmem:[#allocation7 + $0xa8] sm:$0xff]  ;;  %v345_v54 = vld [vmem:[#allocation7 + $0xb8] sm:$0xff] }
  0xa2   : > { %774 = vmatprep.subr.mxu0 %v379_v8  ;;  %935 = vmatprep.subr.mxu1 %v381_v9  ;;  %v316_v52 = vld [vmem:[%s1809_s8 + $0x50] sm:$0xff]  ;;  %v342_v55 = vld [vmem:[#allocation7 + $0xa0] sm:$0xff]  ;;  %v317_v57 = vld [vmem:[%s1809_s8 + $0x58] sm:$0xff] }
  0xa3   : > { %775 = vmatpush1.msra.mxu0 %v378_v10  ;;  %936 = vmatpush1.msra.mxu1 %v380_v11  ;;  %v344_v56 = vld [vmem:[#allocation7 + $0xb0] sm:$0xff]  ;;  %v339_v58 = vld [vmem:[#allocation7 + $0x88] sm:$0xff]  ;;  %v341_v59 = vld [vmem:[#allocation7 + $0x98] sm:$0xff] }
  0xa4   : > { %526 = vmatprep.mubr.f32.mxu0 %v1592_v0  ;;  %687 = vmatprep.mubr.f32.mxu1 %v1592_v0  ;;  %v338_v60 = vld [vmem:[#allocation7 + $0x80] sm:$0xff]  ;;  %v340_v61 = vld [vmem:[#allocation7 + $0x90] sm:$0xff]  ;;  %v335_v63 = vld [vmem:[#allocation7 + $0x68] sm:$0xff] }
  0xa5   : > { %527 = vmatmul.mubr.f32.gmra.mxu0 %v308_v12  ;;  %688 = vmatmul.mubr.f32.gmra.mxu1 %v308_v12  ;;  %v318_v62 = vld [vmem:[%s1809_s8 + $0x60] sm:$0xff]  ;;  %v337_v1 = vld [vmem:[#allocation7 + $0x78] sm:$0xff]  ;;  %v336_v3 = vld [vmem:[#allocation7 + $0x70] sm:$0xff] }
  0xa6   : > { %776 = vmatprep.subr.mxu0 %v375_v13  ;;  %937 = vmatprep.subr.mxu1 %v377_v14  ;;  %v334_v2 = vld [vmem:[#allocation7 + $0x60] sm:$0xff]  ;;  %v319_v4 = vld [vmem:[%s1809_s8 + $0x68] sm:$0xff]  ;;  %v333_v6 = vld [vmem:[#allocation7 + $0x58] sm:$0xff] }
  0xa7   : > { %777 = vmatpush1.msra.mxu0 %v374_v15  ;;  %938 = vmatpush1.msra.mxu1 %v376_v16  ;;  %v331_v5 = vld [vmem:[#allocation7 + $0x48] sm:$0xff]  ;;  %v330_v7 = vld [vmem:[#allocation7 + $0x40] sm:$0xff]  ;;  %v332_v8 = vld [vmem:[#allocation7 + $0x50] sm:$0xff] }
  0xa8   : > { %532 = vmatprep.mubr.f32.mxu0 %v1592_v0  ;;  %693 = vmatprep.mubr.f32.mxu1 %v1592_v0  ;;  %v320_v9 = vld [vmem:[%s1809_s8 + $0x70] sm:$0xff]  ;;  %v327_v10 = vld [vmem:[#allocation7 + $0x28] sm:$0xff]  ;;  %v329_v11 = vld [vmem:[#allocation7 + $0x38] sm:$0xff] }
  0xa9   : > { %533 = vmatmul.mubr.f32.gmra.mxu0 %v309_v17  ;;  %694 = vmatmul.mubr.f32.gmra.mxu1 %v309_v17  ;;  %v326_v12 = vld [vmem:[#allocation7 + $0x20] sm:$0xff]  ;;  %v328_v13 = vld [vmem:[#allocation7 + $0x30] sm:$0xff]  ;;  %v321_v14 = vld [vmem:[%s1809_s8 + $0x78] sm:$0xff] }
  0xaa   : > { %778 = vmatprep.subr.mxu0 %v371_v18  ;;  %939 = vmatprep.subr.mxu1 %v373_v19  ;;  %v323_v15 = vld [vmem:[#allocation7 + $0x8] sm:$0xff]  ;;  %v325_v16 = vld [vmem:[#allocation7 + $0x18] sm:$0xff]  ;;  %v322_v17 = vld [vmem:[#allocation7] sm:$0xff] }
  0xab   : > { %779 = vmatpush1.msra.mxu0 %v370_v20  ;;  %940 = vmatpush1.msra.mxu1 %v372_v21  ;;  %v324_v18 = vld [vmem:[#allocation7 + $0x10] sm:$0xff]  ;;  %v290_v19 = vld [vmem:[%s1802_s26] sm:$0xff]  ;;  %v291_v20 = vld [vmem:[%s1802_s26 + $0x8] sm:$0xff] }
  0xac   : > { %538 = vmatprep.mubr.f32.mxu0 %v1592_v0  ;;  %699 = vmatprep.mubr.f32.mxu1 %v1592_v0  ;;  %v292_v21 = vld [vmem:[%s1802_s26 + $0x10] sm:$0xff] }
  0xad   : > { %539 = vmatmul.mubr.f32.gmra.mxu0 %v310_v22  ;;  %700 = vmatmul.mubr.f32.gmra.mxu1 %v310_v22  ;;  %v293_v22 = vld [vmem:[%s1802_s26 + $0x18] sm:$0xff] }
  0xae   : > { %780 = vmatprep.subr.mxu0 %v367_v23  ;;  %941 = vmatprep.subr.mxu1 %v369_v24  ;;  %v294_v23 = vld [vmem:[%s1802_s26 + $0x20] sm:$0xff]  ;;  %v295_v24 = vld [vmem:[%s1802_s26 + $0x28] sm:$0xff] }
  0xaf   : > { %781 = vmatpush1.msra.mxu0 %v366_v25  ;;  %942 = vmatpush1.msra.mxu1 %v368_v26  ;;  %v296_v25 = vld [vmem:[%s1802_s26 + $0x30] sm:$0xff]  ;;  %v297_v26 = vld [vmem:[%s1802_s26 + $0x38] sm:$0xff] }
  0xb0   : > { %544 = vmatprep.mubr.f32.mxu0 %v1592_v0  ;;  %705 = vmatprep.mubr.f32.mxu1 %v1592_v0 }
  0xb1   : > { %545 = vmatmul.mubr.f32.gmra.mxu0 %v311_v27  ;;  %706 = vmatmul.mubr.f32.gmra.mxu1 %v311_v27  ;;  %v298_v27 = vld [vmem:[%s1802_s26 + $0x40] sm:$0xff] }
  0xb2   : > { %782 = vmatprep.subr.mxu0 %v363_v28  ;;  %943 = vmatprep.subr.mxu1 %v365_v29  ;;  %v299_v28 = vld [vmem:[%s1802_s26 + $0x48] sm:$0xff]  ;;  %v300_v29 = vld [vmem:[%s1802_s26 + $0x50] sm:$0xff] }
  0xb3   : > { %783 = vmatpush1.msra.mxu0 %v362_v30  ;;  %944 = vmatpush1.msra.mxu1 %v364_v31  ;;  %v301_v30 = vld [vmem:[%s1802_s26 + $0x58] sm:$0xff]  ;;  %v302_v31 = vld [vmem:[%s1802_s26 + $0x60] sm:$0xff] }
  0xb4   : > { %550 = vmatprep.mubr.f32.mxu0 %v1592_v0  ;;  %711 = vmatprep.mubr.f32.mxu1 %v1592_v0 }
  0xb5   : > { %551 = vmatmul.mubr.f32.gmra.mxu0 %v312_v32  ;;  %712 = vmatmul.mubr.f32.gmra.mxu1 %v312_v32  ;;  %v303_v32 = vld [vmem:[%s1802_s26 + $0x68] sm:$0xff] }
  0xb6   : > { %784 = vmatprep.subr.mxu0 %v359_v33  ;;  %945 = vmatprep.subr.mxu1 %v361_v34  ;;  %v304_v33 = vld [vmem:[%s1802_s26 + $0x70] sm:$0xff]  ;;  %v305_v34 = vld [vmem:[%s1802_s26 + $0x78] sm:$0xff] }
  0xb7   : > { %785 = vmatpush1.msra.mxu0 %v358_v35  ;;  %946 = vmatpush1.msra.mxu1 %v360_v36 }
  0xb8   : > { %556 = vmatprep.mubr.f32.mxu0 %v1592_v0  ;;  %717 = vmatprep.mubr.f32.mxu1 %v1592_v0 }
  0xb9   : > { %557 = vmatmul.mubr.f32.gmra.mxu0 %v313_v37  ;;  %718 = vmatmul.mubr.f32.gmra.mxu1 %v313_v37 }
  0xba   : > { %786 = vmatprep.subr.mxu0 %v355_v38  ;;  %947 = vmatprep.subr.mxu1 %v357_v39 }
  0xbb   : > { %787 = vmatpush1.msra.mxu0 %v354_v40  ;;  %948 = vmatpush1.msra.mxu1 %v356_v41 }
  0xbc   : > { %562 = vmatprep.mubr.f32.mxu0 %v1592_v0  ;;  %723 = vmatprep.mubr.f32.mxu1 %v1592_v0 }
  0xbd   : > { %563 = vmatmul.mubr.f32.gmra.mxu0 %v314_v42  ;;  %724 = vmatmul.mubr.f32.gmra.mxu1 %v314_v42 }
  0xbe   : > { %788 = vmatprep.subr.mxu0 %v351_v43  ;;  %949 = vmatprep.subr.mxu1 %v353_v44 }
  0xbf   : > { %789 = vmatpush1.msra.mxu0 %v350_v45  ;;  %950 = vmatpush1.msra.mxu1 %v352_v46 }
  0xc0   : > { %568 = vmatprep.mubr.f32.mxu0 %v1592_v0  ;;  %729 = vmatprep.mubr.f32.mxu1 %v1592_v0 }
  0xc1   : > { %569 = vmatmul.mubr.f32.gmra.mxu0 %v315_v47  ;;  %730 = vmatmul.mubr.f32.gmra.mxu1 %v315_v47 }
  0xc2   : > { %790 = vmatprep.subr.mxu0 %v347_v48  ;;  %951 = vmatprep.subr.mxu1 %v349_v49 }
  0xc3   : > { %791 = vmatpush1.msra.mxu0 %v346_v50  ;;  %952 = vmatpush1.msra.mxu1 %v348_v51 }
  0xc4   : > { %574 = vmatprep.mubr.f32.mxu0 %v1592_v0  ;;  %735 = vmatprep.mubr.f32.mxu1 %v1592_v0 }
  0xc5   : > { %575 = vmatmul.mubr.f32.gmra.mxu0 %v316_v52  ;;  %736 = vmatmul.mubr.f32.gmra.mxu1 %v316_v52 }
  0xc6   : > { %792 = vmatprep.subr.mxu0 %v343_v53  ;;  %953 = vmatprep.subr.mxu1 %v345_v54 }
  0xc7   : > { %793 = vmatpush1.msra.mxu0 %v342_v55  ;;  %954 = vmatpush1.msra.mxu1 %v344_v56 }
  0xc8   : > { %580 = vmatprep.mubr.f32.mxu0 %v1592_v0  ;;  %741 = vmatprep.mubr.f32.mxu1 %v1592_v0 }
  0xc9   : > { %581 = vmatmul.mubr.f32.gmra.mxu0 %v317_v57  ;;  %742 = vmatmul.mubr.f32.gmra.mxu1 %v317_v57 }
  0xca   : > { %794 = vmatprep.subr.mxu0 %v339_v58  ;;  %955 = vmatprep.subr.mxu1 %v341_v59 }
  0xcb   : > { %795 = vmatpush1.msra.mxu0 %v338_v60  ;;  %956 = vmatpush1.msra.mxu1 %v340_v61 }
  0xcc   : > { %586 = vmatprep.mubr.f32.mxu0 %v1592_v0  ;;  %747 = vmatprep.mubr.f32.mxu1 %v1592_v0 }
  0xcd   : > { %587 = vmatmul.mubr.f32.gmra.mxu0 %v318_v62  ;;  %748 = vmatmul.mubr.f32.gmra.mxu1 %v318_v62 }
  0xce   : > { %796 = vmatprep.subr.mxu0 %v335_v63  ;;  %957 = vmatprep.subr.mxu1 %v337_v1 }
  0xcf   : > { %797 = vmatpush1.msra.mxu0 %v334_v2  ;;  %958 = vmatpush1.msra.mxu1 %v336_v3 }
  0xd0   : > { %592 = vmatprep.mubr.f32.mxu0 %v1592_v0  ;;  %753 = vmatprep.mubr.f32.mxu1 %v1592_v0 }
  0xd1   : > { %593 = vmatmul.mubr.f32.gmra.mxu0 %v319_v4  ;;  %754 = vmatmul.mubr.f32.gmra.mxu1 %v319_v4 }
  0xd2   : > { %798 = vmatprep.subr.mxu0 %v331_v5  ;;  %959 = vmatprep.subr.mxu1 %v333_v6 }
  0xd3   : > { %799 = vmatpush1.msra.mxu0 %v330_v7  ;;  %960 = vmatpush1.msra.mxu1 %v332_v8 }
  0xd4   : > { %598 = vmatprep.mubr.f32.mxu0 %v1592_v0  ;;  %759 = vmatprep.mubr.f32.mxu1 %v1592_v0 }
  0xd5   : > { %599 = vmatmul.mubr.f32.gmra.mxu0 %v320_v9  ;;  %760 = vmatmul.mubr.f32.gmra.mxu1 %v320_v9 }
  0xd6   : > { %800 = vmatprep.subr.mxu0 %v327_v10  ;;  %961 = vmatprep.subr.mxu1 %v329_v11 }
  0xd7   : > { %801 = vmatpush1.msra.mxu0 %v326_v12  ;;  %962 = vmatpush1.msra.mxu1 %v328_v13 }
  0xd8   : > { %604 = vmatprep.mubr.f32.mxu0 %v1592_v0  ;;  %765 = vmatprep.mubr.f32.mxu1 %v1592_v0 }
  0xd9   : > { %605 = vmatmul.mubr.f32.gmra.mxu0 %v321_v14  ;;  %766 = vmatmul.mubr.f32.gmra.mxu1 %v321_v14 }
  0xda   : > { %802 = vmatprep.subr.mxu0 %v323_v15  ;;  %963 = vmatprep.subr.mxu1 %v325_v16 }
  0xdb   : > { %803 = vmatpush1.msra.mxu0 %v322_v17  ;;  %964 = vmatpush1.msra.mxu1 %v324_v18 }
  0xdc   : > { %836 = vmatprep.mubr.f32.mxu0 %v1592_v0  ;;  %997 = vmatprep.mubr.f32.mxu1 %v1592_v0 }
  0xdd   : > { %837 = vmatmul.mubr.f32.vlgmr.msra.gmra.mxu0 %v290_v19  ;;  %998 = vmatmul.mubr.f32.vlgmr.msra.gmra.mxu1 %v290_v19 }
  0xde   : > { %842 = vmatprep.mubr.f32.mxu0 %v1592_v0  ;;  %1003 = vmatprep.mubr.f32.mxu1 %v1592_v0 }
  0xe1   : > { %843 = vmatmul.mubr.f32.gmra.mxu0 %v291_v20  ;;  %1004 = vmatmul.mubr.f32.gmra.mxu1 %v291_v20 }
  0xe2   : > { %848 = vmatprep.mubr.f32.mxu0 %v1592_v0  ;;  %1009 = vmatprep.mubr.f32.mxu1 %v1592_v0 }
  0xe5   : > { %849 = vmatmul.mubr.f32.gmra.mxu0 %v292_v21  ;;  %1010 = vmatmul.mubr.f32.gmra.mxu1 %v292_v21 }
  0xe6   : > { %854 = vmatprep.mubr.f32.mxu0 %v1592_v0  ;;  %1015 = vmatprep.mubr.f32.mxu1 %v1592_v0 }
  0xe9   : > { %855 = vmatmul.mubr.f32.gmra.mxu0 %v293_v22  ;;  %1016 = vmatmul.mubr.f32.gmra.mxu1 %v293_v22 }
  0xea   : > { %860 = vmatprep.mubr.f32.mxu0 %v1592_v0  ;;  %1021 = vmatprep.mubr.f32.mxu1 %v1592_v0 }
  0xed   : > { %861 = vmatmul.mubr.f32.gmra.mxu0 %v294_v23  ;;  %1022 = vmatmul.mubr.f32.gmra.mxu1 %v294_v23 }
  0xee   : > { %866 = vmatprep.mubr.f32.mxu0 %v1592_v0  ;;  %1027 = vmatprep.mubr.f32.mxu1 %v1592_v0 }
  0xf1   : > { %867 = vmatmul.mubr.f32.gmra.mxu0 %v295_v24  ;;  %1028 = vmatmul.mubr.f32.gmra.mxu1 %v295_v24 }
  0xf2   : > { %872 = vmatprep.mubr.f32.mxu0 %v1592_v0  ;;  %1033 = vmatprep.mubr.f32.mxu1 %v1592_v0 }
  0xf5   : > { %873 = vmatmul.mubr.f32.gmra.mxu0 %v296_v25  ;;  %1034 = vmatmul.mubr.f32.gmra.mxu1 %v296_v25 }
  0xf6   : > { %878 = vmatprep.mubr.f32.mxu0 %v1592_v0  ;;  %1039 = vmatprep.mubr.f32.mxu1 %v1592_v0 }
  0xf9   : > { %879 = vmatmul.mubr.f32.gmra.mxu0 %v297_v26  ;;  %1040 = vmatmul.mubr.f32.gmra.mxu1 %v297_v26 }
  0xfa   : > { %884 = vmatprep.mubr.f32.mxu0 %v1592_v0  ;;  %1045 = vmatprep.mubr.f32.mxu1 %v1592_v0 }
  0xfd   : > { %885 = vmatmul.mubr.f32.gmra.mxu0 %v298_v27  ;;  %1046 = vmatmul.mubr.f32.gmra.mxu1 %v298_v27 }
  0xfe   : > { %890 = vmatprep.mubr.f32.mxu0 %v1592_v0  ;;  %1051 = vmatprep.mubr.f32.mxu1 %v1592_v0 }
 0x101   : > { %891 = vmatmul.mubr.f32.gmra.mxu0 %v299_v28  ;;  %1052 = vmatmul.mubr.f32.gmra.mxu1 %v299_v28 }
 0x102   : > { %896 = vmatprep.mubr.f32.mxu0 %v1592_v0  ;;  %1057 = vmatprep.mubr.f32.mxu1 %v1592_v0 }
 0x105   : > { %897 = vmatmul.mubr.f32.gmra.mxu0 %v300_v29  ;;  %1058 = vmatmul.mubr.f32.gmra.mxu1 %v300_v29 }
 0x106   : > { %902 = vmatprep.mubr.f32.mxu0 %v1592_v0  ;;  %1063 = vmatprep.mubr.f32.mxu1 %v1592_v0 }
 0x109   : > { %903 = vmatmul.mubr.f32.gmra.mxu0 %v301_v30  ;;  %1064 = vmatmul.mubr.f32.gmra.mxu1 %v301_v30 }
 0x10a   : > { %908 = vmatprep.mubr.f32.mxu0 %v1592_v0  ;;  %1069 = vmatprep.mubr.f32.mxu1 %v1592_v0 }
 0x10d   : > { %909 = vmatmul.mubr.f32.gmra.mxu0 %v302_v31  ;;  %1070 = vmatmul.mubr.f32.gmra.mxu1 %v302_v31 }
 0x10e   : > { %914 = vmatprep.mubr.f32.mxu0 %v1592_v0  ;;  %1075 = vmatprep.mubr.f32.mxu1 %v1592_v0 }
 0x111   : > { %915 = vmatmul.mubr.f32.gmra.mxu0 %v303_v32  ;;  %1076 = vmatmul.mubr.f32.gmra.mxu1 %v303_v32 }
 0x112   : > { %920 = vmatprep.mubr.f32.mxu0 %v1592_v0  ;;  %1081 = vmatprep.mubr.f32.mxu1 %v1592_v0 }
 0x115   : > { %921 = vmatmul.mubr.f32.gmra.mxu0 %v304_v33  ;;  %1082 = vmatmul.mubr.f32.gmra.mxu1 %v304_v33 }
 0x116   : > { %926 = vmatprep.mubr.f32.mxu0 %v1592_v0  ;;  %1087 = vmatprep.mubr.f32.mxu1 %v1592_v0 }
 0x119   : > { %927 = vmatmul.mubr.f32.gmra.mxu0 %v305_v34  ;;  %1088 = vmatmul.mubr.f32.gmra.mxu1 %v305_v34 }
 0x15d   : > { %v1919_v35 = vpop.f32.mrf.mxu0  ;;  %v1921_v36 = vpop.f32.mrf.mxu1 }
 0x15f   : > { %v1923_v37 = vpop.f32.mrf.mxu0  ;;  %v1925_v38 = vpop.f32.mrf.mxu1 }
 0x161   : > { %v1927_v39 = vpop.f32.mrf.mxu0  ;;  %v1929_v40 = vpop.f32.mrf.mxu1 }
 0x163   : > { %v1931_v41 = vpop.f32.mrf.mxu0  ;;  %v1933_v42 = vpop.f32.mrf.mxu1 }
 0x165   : > { %v1935_v0 = vpop.f32.mrf.mxu0  ;;  %v1937_v43 = vpop.f32.mrf.mxu1 }
 0x167   : > { %v1939_v44 = vpop.f32.mrf.mxu0  ;;  %v1941_v45 = vpop.f32.mrf.mxu1 }
 0x169   : > { %v1943_v46 = vpop.f32.mrf.mxu0  ;;  %v1945_v47 = vpop.f32.mrf.mxu1 }
 0x16b   : > { %v1947_v48 = vpop.f32.mrf.mxu0  ;;  %v1949_v49 = vpop.f32.mrf.mxu1 }
 0x16d   : > { %v1951_v50 = vpop.f32.mrf.mxu0  ;;  %v1953_v51 = vpop.f32.mrf.mxu1 }
 0x16f   : > { %v1955_v52 = vpop.f32.mrf.mxu0  ;;  %v1957_v53 = vpop.f32.mrf.mxu1 }
 0x171   : > { %v1959_v54 = vpop.f32.mrf.mxu0  ;;  %v1961_v55 = vpop.f32.mrf.mxu1 }
 0x173   : > { %v1963_v56 = vpop.f32.mrf.mxu0  ;;  %v1965_v57 = vpop.f32.mrf.mxu1 }
 0x175   : > { %v1967_v58 = vpop.f32.mrf.mxu0  ;;  %v1969_v59 = vpop.f32.mrf.mxu1 }
 0x177   : > { %v1971_v60 = vpop.f32.mrf.mxu0  ;;  %v1973_v61 = vpop.f32.mrf.mxu1 }
 0x179   : > { %v1975_v62 = vpop.f32.mrf.mxu0  ;;  %v1977_v63 = vpop.f32.mrf.mxu1 }
 0x17b   : > { %v1979_v1 = vpop.f32.mrf.mxu0  ;;  %v1981_v2 = vpop.f32.mrf.mxu1 }
 0x17d   : > { %v1983_v3 = vpop.f32.mrf.mxu0  ;;  %v1985_v4 = vpop.f32.mrf.mxu1 }
 0x17f   : > { %v1987_v5 = vpop.f32.mrf.mxu0  ;;  %v1989_v6 = vpop.f32.mrf.mxu1 }
 0x181   : > { %v1991_v7 = vpop.f32.mrf.mxu0  ;;  %v1993_v8 = vpop.f32.mrf.mxu1 }
 0x183   : > { %v1995_v9 = vpop.f32.mrf.mxu0  ;;  %v1997_v10 = vpop.f32.mrf.mxu1 }
 0x185   : > { %v1999_v11 = vpop.f32.mrf.mxu0  ;;  %v2001_v12 = vpop.f32.mrf.mxu1 }
 0x187   : > { %v2003_v13 = vpop.f32.mrf.mxu0  ;;  %v2005_v14 = vpop.f32.mrf.mxu1 }
 0x189   : > { %v2007_v15 = vpop.f32.mrf.mxu0  ;;  %v2009_v16 = vpop.f32.mrf.mxu1 }
 0x18b   : > { %v2011_v17 = vpop.f32.mrf.mxu0  ;;  %v2013_v18 = vpop.f32.mrf.mxu1 }
 0x18d   : > { %v2015_v19 = vpop.f32.mrf.mxu0  ;;  %v2017_v20 = vpop.f32.mrf.mxu1 }
 0x18f   : > { %v2019_v21 = vpop.f32.mrf.mxu0  ;;  %v2021_v22 = vpop.f32.mrf.mxu1 }
 0x191   : > { %v2023_v23 = vpop.f32.mrf.mxu0  ;;  %v2025_v24 = vpop.f32.mrf.mxu1 }
 0x192   : > { %2250 = vst [vmem:[#allocation16_spill] sm:$0xff] %v2023_v23  ;;  %2251 = vst [vmem:[#allocation17_spill] sm:$0xff] %v2025_v24 }
 0x193   : > { %v2027_v25 = vpop.f32.mrf.mxu0  ;;  %v2029_v26 = vpop.f32.mrf.mxu1 }
 0x194   : > { %2252 = vst [vmem:[#allocation18_spill] sm:$0xff] %v2027_v25  ;;  %2253 = vst [vmem:[#allocation19_spill] sm:$0xff] %v2029_v26 }
 0x195   : > { %v2031_v27 = vpop.f32.mrf.mxu0  ;;  %v2033_v28 = vpop.f32.mrf.mxu1 }
 0x196   : > { %2254 = vst [vmem:[#allocation20_spill] sm:$0xff] %v2031_v27  ;;  %2255 = vst [vmem:[#allocation21_spill] sm:$0xff] %v2033_v28 }
 0x197   : > { %v2035_v29 = vpop.f32.mrf.mxu0  ;;  %v2037_v30 = vpop.f32.mrf.mxu1 }
 0x199   : > { %v2039_v31 = vpop.f32.mrf.mxu0  ;;  %v2041_v32 = vpop.f32.mrf.mxu1 }
 0x19a   : > { %2256 = vst [vmem:[#allocation22_spill] sm:$0xff] %v2039_v31  ;;  %2257 = vst [vmem:[#allocation23_spill] sm:$0xff] %v2041_v32 }
 0x19b   : > { %v2044_v33 = vpop.f32.mrf.mxu0  ;;  %v2046_v34 = vpop.f32.mrf.mxu1 }
 0x19c   : > { %2258 = vst [vmem:[#allocation24_spill] sm:$0xff] %v2044_v33  ;;  %2259 = vst [vmem:[#allocation25_spill] sm:$0xff] %v2046_v34 }
 0x19d   : > { %v838_v25 = vpop.f32.mrf.mxu0  ;;  %v999_v24 = vpop.f32.mrf.mxu1 }
 0x19e   : > { %v839_v26 = vadd.f32 %v838_v25, %v1919_v35  ;;  %v1000_v27 = vadd.f32 %v999_v24, %v1921_v36 }
 0x19f   : > { %v840_v28 = vpop.f32.mrf.mxu0  ;;  %v1001_v23 = vpop.f32.mrf.mxu1 }
 0x1a0   : > { %1094 = vst [vmem:[%s2050_s10] sm:$0xff] %v839_v26  ;;  %1096 = vst [vmem:[%s2050_s10 + $0x10] sm:$0xff] %v1000_v27  ;;  %v841_v34 = vadd.f32 %v840_v28, %v1923_v37  ;;  %v1002_v33 = vadd.f32 %v1001_v23, %v1925_v38 }
 0x1a1   : > { %v844_v35 = vpop.f32.mrf.mxu0  ;;  %v1005_v36 = vpop.f32.mrf.mxu1 }
 0x1a2   : > { %1095 = vst [vmem:[%s2050_s10 + $0x8] sm:$0xff] %v841_v34  ;;  %1097 = vst [vmem:[%s2050_s10 + $0x18] sm:$0xff] %v1002_v33  ;;  %v845_v24 = vadd.f32 %v844_v35, %v1927_v39  ;;  %v1006_v25 = vadd.f32 %v1005_v36, %v1929_v40 }
 0x1a3   : > { %v846_v32 = vpop.f32.mrf.mxu0  ;;  %v1007_v31 = vpop.f32.mrf.mxu1 }
 0x1a4   : > { %1098 = vst [vmem:[%s2050_s10 + $0x20] sm:$0xff] %v845_v24  ;;  %1100 = vst [vmem:[%s2050_s10 + $0x30] sm:$0xff] %v1006_v25  ;;  %v847_v37 = vadd.f32 %v846_v32, %v1931_v41  ;;  %v1008_v38 = vadd.f32 %v1007_v31, %v1933_v42 }
 0x1a5   : > { %v850_v23 = vpop.f32.mrf.mxu0  ;;  %v1011_v26 = vpop.f32.mrf.mxu1 }
 0x1a6   : > { %1099 = vst [vmem:[%s2050_s10 + $0x28] sm:$0xff] %v847_v37  ;;  %1101 = vst [vmem:[%s2050_s10 + $0x38] sm:$0xff] %v1008_v38  ;;  %v851_v39 = vadd.f32 %v850_v23, %v1935_v0  ;;  %v1012_v40 = vadd.f32 %v1011_v26, %v1937_v43 }
 0x1a7   : > { %v852_v27 = vpop.f32.mrf.mxu0  ;;  %v1013_v28 = vpop.f32.mrf.mxu1 }
 0x1a8   : > { %1102 = vst [vmem:[%s2050_s10 + $0x40] sm:$0xff] %v851_v39  ;;  %1104 = vst [vmem:[%s2050_s10 + $0x50] sm:$0xff] %v1012_v40  ;;  %v853_v41 = vadd.f32 %v852_v27, %v1939_v44  ;;  %v1014_v42 = vadd.f32 %v1013_v28, %v1941_v45 }
 0x1a9   : > { %v856_v31 = vpop.f32.mrf.mxu0  ;;  %v1017_v32 = vpop.f32.mrf.mxu1 }
 0x1aa   : > { %1103 = vst [vmem:[%s2050_s10 + $0x48] sm:$0xff] %v853_v41  ;;  %1105 = vst [vmem:[%s2050_s10 + $0x58] sm:$0xff] %v1014_v42  ;;  %v857_v0 = vadd.f32 %v856_v31, %v1943_v46  ;;  %v1018_v43 = vadd.f32 %v1017_v32, %v1945_v47 }
 0x1ab   : > { %v858_v33 = vpop.f32.mrf.mxu0  ;;  %v1019_v34 = vpop.f32.mrf.mxu1 }
 0x1ac   : > { %1106 = vst [vmem:[%s2050_s10 + $0x60] sm:$0xff] %v857_v0  ;;  %1108 = vst [vmem:[%s2050_s10 + $0x70] sm:$0xff] %v1018_v43  ;;  %v859_v44 = vadd.f32 %v858_v33, %v1947_v48  ;;  %v1020_v45 = vadd.f32 %v1019_v34, %v1949_v49 }
 0x1ad   : > { %v862_v35 = vpop.f32.mrf.mxu0  ;;  %v1023_v36 = vpop.f32.mrf.mxu1 }
 0x1ae   : > { %1107 = vst [vmem:[%s2050_s10 + $0x68] sm:$0xff] %v859_v44  ;;  %1109 = vst [vmem:[%s2050_s10 + $0x78] sm:$0xff] %v1020_v45  ;;  %v863_v46 = vadd.f32 %v862_v35, %v1951_v50  ;;  %v1024_v47 = vadd.f32 %v1023_v36, %v1953_v51 }
 0x1af   : > { %v864_v24 = vpop.f32.mrf.mxu0  ;;  %v1025_v25 = vpop.f32.mrf.mxu1 }
 0x1b0   : > { %1110 = vst [vmem:[%s2050_s10 + $0x80] sm:$0xff] %v863_v46  ;;  %1112 = vst [vmem:[%s2050_s10 + $0x90] sm:$0xff] %v1024_v47  ;;  %v865_v48 = vadd.f32 %v864_v24, %v1955_v52  ;;  %v1026_v49 = vadd.f32 %v1025_v25, %v1957_v53 }
 0x1b1   : > { %v868_v37 = vpop.f32.mrf.mxu0  ;;  %v1029_v38 = vpop.f32.mrf.mxu1 }
 0x1b2   : > { %1111 = vst [vmem:[%s2050_s10 + $0x88] sm:$0xff] %v865_v48  ;;  %1113 = vst [vmem:[%s2050_s10 + $0x98] sm:$0xff] %v1026_v49  ;;  %v869_v50 = vadd.f32 %v868_v37, %v1959_v54  ;;  %v1030_v51 = vadd.f32 %v1029_v38, %v1961_v55 }
 0x1b3   : > { %v870_v23 = vpop.f32.mrf.mxu0  ;;  %v1031_v26 = vpop.f32.mrf.mxu1 }
 0x1b4   : > { %1114 = vst [vmem:[%s2050_s10 + $0xa0] sm:$0xff] %v869_v50  ;;  %1116 = vst [vmem:[%s2050_s10 + $0xb0] sm:$0xff] %v1030_v51  ;;  %v871_v52 = vadd.f32 %v870_v23, %v1963_v56  ;;  %v1032_v53 = vadd.f32 %v1031_v26, %v1965_v57 }
 0x1b5   : > { %v874_v39 = vpop.f32.mrf.mxu0  ;;  %v1035_v40 = vpop.f32.mrf.mxu1 }
 0x1b6   : > { %1115 = vst [vmem:[%s2050_s10 + $0xa8] sm:$0xff] %v871_v52  ;;  %1117 = vst [vmem:[%s2050_s10 + $0xb8] sm:$0xff] %v1032_v53  ;;  %v875_v54 = vadd.f32 %v874_v39, %v1967_v58  ;;  %v1036_v55 = vadd.f32 %v1035_v40, %v1969_v59  ;;  %v2260_v39 = vld [vmem:[#allocation16_spill] sm:$0xff]  ;;  %v2261_v40 = vld [vmem:[#allocation17_spill] sm:$0xff] }
 0x1b7   : > { %v876_v27 = vpop.f32.mrf.mxu0  ;;  %v1037_v28 = vpop.f32.mrf.mxu1 }
 0x1b8   : > { %1118 = vst [vmem:[%s2050_s10 + $0xc0] sm:$0xff] %v875_v54  ;;  %1120 = vst [vmem:[%s2050_s10 + $0xd0] sm:$0xff] %v1036_v55  ;;  %v877_v56 = vadd.f32 %v876_v27, %v1971_v60  ;;  %v1038_v57 = vadd.f32 %v1037_v28, %v1973_v61 }
 0x1b9   : > { %v880_v41 = vpop.f32.mrf.mxu0  ;;  %v1041_v42 = vpop.f32.mrf.mxu1 }
 0x1ba   : > { %1119 = vst [vmem:[%s2050_s10 + $0xc8] sm:$0xff] %v877_v56  ;;  %1121 = vst [vmem:[%s2050_s10 + $0xd8] sm:$0xff] %v1038_v57  ;;  %v881_v58 = vadd.f32 %v880_v41, %v1975_v62  ;;  %v1042_v59 = vadd.f32 %v1041_v42, %v1977_v63  ;;  %v2264_v41 = vld [vmem:[#allocation20_spill] sm:$0xff] }
 0x1bb   : > { %v882_v31 = vpop.f32.mrf.mxu0  ;;  %v1043_v32 = vpop.f32.mrf.mxu1 }
 0x1bc   : > { %1122 = vst [vmem:[%s2050_s10 + $0xe0] sm:$0xff] %v881_v58  ;;  %1124 = vst [vmem:[%s2050_s10 + $0xf0] sm:$0xff] %v1042_v59  ;;  %v883_v60 = vadd.f32 %v882_v31, %v1979_v1  ;;  %v1044_v61 = vadd.f32 %v1043_v32, %v1981_v2  ;;  %v2265_v58 = vld [vmem:[#allocation21_spill] sm:$0xff] }
 0x1bd   : > { %v886_v0 = vpop.f32.mrf.mxu0  ;;  %v1047_v43 = vpop.f32.mrf.mxu1 }
 0x1be   : > { %1123 = vst [vmem:[%s2050_s10 + $0xe8] sm:$0xff] %v883_v60  ;;  %1125 = vst [vmem:[%s2050_s10 + $0xf8] sm:$0xff] %v1044_v61  ;;  %v887_v62 = vadd.f32 %v886_v0, %v1983_v3  ;;  %v1048_v63 = vadd.f32 %v1047_v43, %v1985_v4 }
 0x1bf   : > { %v888_v33 = vpop.f32.mrf.mxu0  ;;  %v1049_v34 = vpop.f32.mrf.mxu1 }
 0x1c0   : > { %1126 = vst [vmem:[%s2050_s10 + $0x100] sm:$0xff] %v887_v62  ;;  %1128 = vst [vmem:[%s2050_s10 + $0x110] sm:$0xff] %v1048_v63  ;;  %v889_v1 = vadd.f32 %v888_v33, %v1987_v5  ;;  %v1050_v2 = vadd.f32 %v1049_v34, %v1989_v6  ;;  %v2266_v62 = vld [vmem:[#allocation22_spill] sm:$0xff]  ;;  %v2267_v33 = vld [vmem:[#allocation23_spill] sm:$0xff] }
 0x1c1   : > { %v892_v44 = vpop.f32.mrf.mxu0  ;;  %v1053_v45 = vpop.f32.mrf.mxu1 }
 0x1c2   : > { %1127 = vst [vmem:[%s2050_s10 + $0x108] sm:$0xff] %v889_v1  ;;  %1129 = vst [vmem:[%s2050_s10 + $0x118] sm:$0xff] %v1050_v2  ;;  %v893_v3 = vadd.f32 %v892_v44, %v1991_v7  ;;  %v1054_v4 = vadd.f32 %v1053_v45, %v1993_v8  ;;  %v2269_v44 = vld [vmem:[#allocation25_spill] sm:$0xff] }
 0x1c3   : > { %v894_v35 = vpop.f32.mrf.mxu0  ;;  %v1055_v36 = vpop.f32.mrf.mxu1 }
 0x1c4   : > { %1130 = vst [vmem:[%s2050_s10 + $0x120] sm:$0xff] %v893_v3  ;;  %1132 = vst [vmem:[%s2050_s10 + $0x130] sm:$0xff] %v1054_v4  ;;  %v895_v5 = vadd.f32 %v894_v35, %v1995_v9  ;;  %v1056_v6 = vadd.f32 %v1055_v36, %v1997_v10 }
 0x1c5   : > { %v898_v46 = vpop.f32.mrf.mxu0  ;;  %v1059_v47 = vpop.f32.mrf.mxu1 }
 0x1c6   : > { %1131 = vst [vmem:[%s2050_s10 + $0x128] sm:$0xff] %v895_v5  ;;  %1133 = vst [vmem:[%s2050_s10 + $0x138] sm:$0xff] %v1056_v6  ;;  %v899_v7 = vadd.f32 %v898_v46, %v1999_v11  ;;  %v1060_v8 = vadd.f32 %v1059_v47, %v2001_v12 }
 0x1c7   : > { %v900_v24 = vpop.f32.mrf.mxu0  ;;  %v1061_v25 = vpop.f32.mrf.mxu1 }
 0x1c8   : > { %1134 = vst [vmem:[%s2050_s10 + $0x140] sm:$0xff] %v899_v7  ;;  %1136 = vst [vmem:[%s2050_s10 + $0x150] sm:$0xff] %v1060_v8  ;;  %v901_v9 = vadd.f32 %v900_v24, %v2003_v13  ;;  %v1062_v10 = vadd.f32 %v1061_v25, %v2005_v14 }
 0x1c9   : > { %v904_v48 = vpop.f32.mrf.mxu0  ;;  %v1065_v49 = vpop.f32.mrf.mxu1 }
 0x1ca   : > { %1135 = vst [vmem:[%s2050_s10 + $0x148] sm:$0xff] %v901_v9  ;;  %1137 = vst [vmem:[%s2050_s10 + $0x158] sm:$0xff] %v1062_v10  ;;  %v905_v11 = vadd.f32 %v904_v48, %v2007_v15  ;;  %v1066_v12 = vadd.f32 %v1065_v49, %v2009_v16 }
 0x1cb   : > { %v906_v37 = vpop.f32.mrf.mxu0  ;;  %v1067_v38 = vpop.f32.mrf.mxu1 }
 0x1cc   : > { %1138 = vst [vmem:[%s2050_s10 + $0x160] sm:$0xff] %v905_v11  ;;  %1140 = vst [vmem:[%s2050_s10 + $0x170] sm:$0xff] %v1066_v12  ;;  %v907_v13 = vadd.f32 %v906_v37, %v2011_v17  ;;  %v1068_v14 = vadd.f32 %v1067_v38, %v2013_v18 }
 0x1cd   : > { %v910_v50 = vpop.f32.mrf.mxu0  ;;  %v1071_v51 = vpop.f32.mrf.mxu1 }
 0x1ce   : > { %1139 = vst [vmem:[%s2050_s10 + $0x168] sm:$0xff] %v907_v13  ;;  %1141 = vst [vmem:[%s2050_s10 + $0x178] sm:$0xff] %v1068_v14  ;;  %v911_v15 = vadd.f32 %v910_v50, %v2015_v19  ;;  %v1072_v16 = vadd.f32 %v1071_v51, %v2017_v20 }
 0x1cf   : > { %v912_v23 = vpop.f32.mrf.mxu0  ;;  %v1073_v26 = vpop.f32.mrf.mxu1 }
 0x1d0   : > { %1142 = vst [vmem:[%s2050_s10 + $0x180] sm:$0xff] %v911_v15  ;;  %1144 = vst [vmem:[%s2050_s10 + $0x190] sm:$0xff] %v1072_v16  ;;  %v913_v17 = vadd.f32 %v912_v23, %v2019_v21  ;;  %v1074_v18 = vadd.f32 %v1073_v26, %v2021_v22  ;;  %v2262_v21 = vld [vmem:[#allocation18_spill] sm:$0xff]  ;;  %v2263_v22 = vld [vmem:[#allocation19_spill] sm:$0xff] }
 0x1d1   : > { %v916_v52 = vpop.f32.mrf.mxu0  ;;  %v1077_v53 = vpop.f32.mrf.mxu1 }
 0x1d2   : > { %1143 = vst [vmem:[%s2050_s10 + $0x188] sm:$0xff] %v913_v17  ;;  %1145 = vst [vmem:[%s2050_s10 + $0x198] sm:$0xff] %v1074_v18  ;;  %v917_v19 = vadd.f32 %v916_v52, %v2260_v39  ;;  %v1078_v20 = vadd.f32 %v1077_v53, %v2261_v40 }
 0x1d3   : > { %v918_v54 = vpop.f32.mrf.mxu0  ;;  %v1079_v55 = vpop.f32.mrf.mxu1 }
 0x1d4   : > { %1146 = vst [vmem:[%s2050_s10 + $0x1a0] sm:$0xff] %v917_v19  ;;  %1148 = vst [vmem:[%s2050_s10 + $0x1b0] sm:$0xff] %v1078_v20  ;;  %v919_v27 = vadd.f32 %v918_v54, %v2262_v21  ;;  %v1080_v28 = vadd.f32 %v1079_v55, %v2263_v22 }
 0x1d5   : > { %v922_v56 = vpop.f32.mrf.mxu0  ;;  %v1083_v57 = vpop.f32.mrf.mxu1 }
 0x1d6   : > { %1147 = vst [vmem:[%s2050_s10 + $0x1a8] sm:$0xff] %v919_v27  ;;  %1149 = vst [vmem:[%s2050_s10 + $0x1b8] sm:$0xff] %v1080_v28  ;;  %v923_v42 = vadd.f32 %v922_v56, %v2264_v41  ;;  %v1084_v59 = vadd.f32 %v1083_v57, %v2265_v58 }
 0x1d7   : > { %v924_v31 = vpop.f32.mrf.mxu0  ;;  %v1085_v32 = vpop.f32.mrf.mxu1 }
 0x1d8   : > { %1150 = vst [vmem:[%s2050_s10 + $0x1c0] sm:$0xff] %v923_v42  ;;  %1152 = vst [vmem:[%s2050_s10 + $0x1d0] sm:$0xff] %v1084_v59  ;;  %v925_v60 = vadd.f32 %v924_v31, %v2035_v29  ;;  %v1086_v61 = vadd.f32 %v1085_v32, %v2037_v30  ;;  %v2268_v29 = vld [vmem:[#allocation24_spill] sm:$0xff] }
 0x1d9   : > { %v928_v0 = vpop.f32.mrf.mxu0  ;;  %v1089_v43 = vpop.f32.mrf.mxu1 }
 0x1da   : > { %1151 = vst [vmem:[%s2050_s10 + $0x1c8] sm:$0xff] %v925_v60  ;;  %1153 = vst [vmem:[%s2050_s10 + $0x1d8] sm:$0xff] %v1086_v61  ;;  %v929_v63 = vadd.f32 %v928_v0, %v2266_v62  ;;  %v1090_v34 = vadd.f32 %v1089_v43, %v2267_v33 }
 0x1db   : > { %v930_v1 = vpop.f32.mrf.mxu0  ;;  %v1091_v2 = vpop.f32.mrf.mxu1 }
 0x1dc   : > { %1154 = vst [vmem:[%s2050_s10 + $0x1e0] sm:$0xff] %v929_v63  ;;  %1156 = vst [vmem:[%s2050_s10 + $0x1f0] sm:$0xff] %v1090_v34  ;;  %v931_v30 = vadd.f32 %v930_v1, %v2268_v29  ;;  %v1092_v45 = vadd.f32 %v1091_v2, %v2269_v44 }
 0x1de   : > { %1155 = vst [vmem:[%s2050_s10 + $0x1e8] sm:$0xff] %v931_v30  ;;  %1157 = vst [vmem:[%s2050_s10 + $0x1f8] sm:$0xff] %v1092_v45 }
 0x1df   : > { %1519 = shalt.err (!%p1516_p3)
}
 0x1e0   : > { %s1520_s29 = scalar_lea.hbm %s2177_s12, 8192  ;;  %s1524_s6 = scalar_lea.hbm %s2232_s4, 16384 }
 0x1e1   : > { %p1521_p2 = scmp.ne.s32.totalorder %s2177_s12, %s1520_s29  ;;  %p1525_p11 = scmp.lt.s32.totalorder %s2177_s12, %s2232_s4 }
 0x1e2   : > { %p1526_p10 = scmp.lt.s32.totalorder %s1524_s6, %s1520_s29 }
 0x1e3   : > { %p1522_p0 = pnand %p1521_p2, %p2270_p7 }
 0x1e4   : > { %p1527_p6 = por %p1526_p10, %p1525_p11 }
 0x1e5   : > { %p1523_p8 = pneg %p1522_p0 }
 0x1e7   : > { %p1528_p12 = pnand %p1527_p6, %p1523_p8 }
 0x1e9   : > { %1531 = shalt.err (!%p1528_p12)
}
 0x1ea   : > { %s1594_s21 = smov 512   ;;  %s1595_s10 = smov 32  }
 0x1eb   : > { %1331 = dma.vmem_to_hbm [thread:$0]  (%p2270_p7), %s2179_s28, 8192, %s2177_s12, %s1159_s19, %s1594_s21, %s1594_s21, %s1595_s10  }
 0x1ec PF: > { %s1188_s27 = sand.u32 1, %s1570_s15   ;;  %p2271_p9 = scmp.ne.s32.totalorder %s2238_s22, 0 }
 0x1ed   : > { %p2272_p13 = scmp.ge.s32.totalorder %s1582_s18, 2  ;;  %s1189_s9 = scalar_lea.sflag [#allocation4], %s1188_s27 }
 0x1ef   : > { %p1348_p5 = pnand %p2272_p13, %p2271_p9 }
 0x1f1   : > { %p1349_p1 = pneg %p1348_p5 }
 0x1f3   : > { %1565 = dma.done.wait (%p1349_p1), %s1189_s9, 8192  }
 0x1f4   : > { %1567 = vsyncadd (%p1349_p1), %s1189_s9, 4294959104  ;;  %p21_p4 = scmp.ge.s32.totalorder %s1693_s11, 4   ;;  %s2273_s15 = smov %s1574_s16 }
 0x1f5   : > { %s2274_s16 = smov %s1578_s17  ;;  %s2275_s17 = smov %s1709_s20 }
 0x1f6   : > { %s2276_s18 = smov %s1693_s11  ;;  %23 = sbr.rel (!%p21_p4) target bundleno = 10 (0xa), region = 102 }
 0x1fb   :  { %1194 = vsyncpa [#allocation3], 1 }
 0x1fc   :  { %1196 = vsyncpa [#allocation3 + $0x1], 1 }
 0x1fd   :  { %1197 = vsyncpa [#allocation6], 1 }
 0x1fe   :  { %1199 = vsyncpa [#allocation6 + $0x1], 1 }
 0x1ff   :  { %1200 = vsyncpa [#allocation9], 1 }
 0x200   :  { %1201 = vsyncpa [#allocation4], 1 }
 0x201   :  { %1203 = vsyncpa [#allocation4 + $0x1], 1 }

</bundles_post_ra>
